<compile_context>
chip_gen: v7x
topology: tpu7x:2x2x1
jax: 0.10.0
libtpu: 0.0.40
codegen_flags: <defaults>
</compile_context>

<pallas_src>
import functools
import math

import jax
import jax.numpy as jnp
import numpy as np
from jax import lax
from jax.experimental import pallas as pl
from jax.experimental.pallas import tpu as pltpu

# Model hyper-parameters (fixed by the PyTorch module __init__)
C_IN, C_OUT = 22, 16
KH, KW = 12, 15
SH, SW = 5, 5
PH, PW = 6, 6
MIN_V, MAX_V = 159620.0, 546218.0

# Phase decomposition: out[SH*qh+ph, SW*qw+pw, co] only reads input pixels
#   ih = qh + o_h, iw = qw + o_w with o_h, o_w in [-1, 2]   (4x4 tap window)
# using weight tap kh = ph + PH + SH - SH*(o_h+1), kw = pw + PW + SW - SW*(o_w+1)
# (masked to zero when outside the kernel).  The 25 phases are packed along the
# matmul N dimension, so the transposed conv is one matmul and col2im is a pure
# reshape/transpose in the wrapper.
TAP_H, TAP_W = 4, 4
TAPS = TAP_H * TAP_W            # 16
PHASES = SH * SW                # 25
K_DIM = TAPS * C_IN             # 352 valid contraction lanes
N_DIM = PHASES * C_OUT          # 400 valid output lanes
K_PAD = 384                     # 3 x 128 ; row K_DIM carries the folded bias
N_PAD = 512                     # 4 x 128 ; lane-dense output -> no masked stores

TM_MAX = 256                    # M tile (multiple of 8); safe for v5e scoped VMEM


def _fused_kernel(xcol_ref, w_ref, o_ref, *, min_v, max_v):
    # xcol_ref: (TM, K_PAD)   im2col'd input rows (+ ones column for the bias)
    # w_ref   : (K_PAD, N_PAD) phase-packed transposed-conv weights + bias row
    # o_ref   : (TM, N_PAD)    phase-packed, lane-dense output
    acc = jnp.dot(xcol_ref[...], w_ref[...], preferred_element_type=jnp.float32)
    o_ref[...] = jnp.clip(acc, min_v, max_v)


def pack_params(w_t, bias, compute_dtype=jnp.bfloat16):
    """One-time packing of ConvTranspose2d params (hoisted out of the forward).

    w_t: (C_IN, C_OUT, KH, KW) PyTorch layout; bias: (C_OUT,).
    Returns W_ext (K_PAD, N_PAD) with the bias folded into row K_DIM."""
    ph = np.arange(SH)
    th = np.arange(TAP_H)
    pw = np.arange(SW)
    tw = np.arange(TAP_W)
    kh_idx = ph[:, None] + (PH + SH) - SH * th[None, :]          # (5, 4)
    kw_idx = pw[:, None] + (PW + SW) - SW * tw[None, :]          # (5, 4)
    valid_h = (kh_idx >= 0) & (kh_idx < KH)
    valid_w = (kw_idx >= 0) & (kw_idx < KW)
    kh_c = np.clip(kh_idx, 0, KH - 1)
    kw_c = np.clip(kw_idx, 0, KW - 1)

    w32 = jnp.asarray(w_t, jnp.float32)
    # gathered[ci, co, ph, th, pw, tw] = w[ci, co, kh(ph,th), kw(pw,tw)]
    gathered = w32[:, :, kh_c[:, :, None, None], kw_c[None, None, :, :]]
    mask = valid_h[:, :, None, None] & valid_w[None, None, :, :]
    gathered = gathered * jnp.asarray(mask, jnp.float32)[None, None]
    # rows = (th, tw, ci), cols = (ph, pw, co)
    w_big = jnp.transpose(gathered, (3, 5, 0, 2, 4, 1)).reshape(K_DIM, N_DIM)
    bias_tiled = jnp.tile(jnp.asarray(bias, jnp.float32), PHASES)        # (400,)

    w_ext = jnp.zeros((K_PAD, N_PAD), jnp.float32)
    w_ext = w_ext.at[:K_DIM, :N_DIM].set(w_big)
    w_ext = w_ext.at[K_DIM, :N_DIM].set(bias_tiled)   # bias row (ones col of X)
    return w_ext.astype(compute_dtype)


def conv_transpose_clamp(x_nchw, w_ext, min_value=MIN_V, max_value=MAX_V):
    """x_nchw: (1, C_IN, H, W); w_ext from pack_params (its dtype = compute dtype)."""
    n, c_in, h_in, w_in = x_nchw.shape
    assert n == 1 and c_in == C_IN
    oh = (h_in - 1) * SH - 2 * PH + KH        # = 5*(H-1)
    ow = (w_in - 1) * SW - 2 * PW + KW        # = 5*(W-1) + 3
    qh = h_in - 1                             # exact row groups (oh == SH*qh)
    qw = w_in                                 # padded col groups (SW*qw >= ow)
    assert SH * qh == oh and SW * qw >= ow
    compute_dtype = w_ext.dtype

    # ---- wrapper-side layout plumbing (no arithmetic) ----
    # TODO(synk): for very large H,W move the 16-tap im2col gather in-kernel
    # (static slices of a VMEM-resident padded tile) to cut HBM read amplification.
    x_hwc = jnp.transpose(x_nchw[0], (1, 2, 0)).astype(jnp.float32)   # (H, W, C_IN)
    x_pad = jnp.pad(x_hwc, ((1, 1), (1, 2), (0, 0)))                  # (H+2, W+3, C_IN)
    cols = []
    for th in range(TAP_H):
        for tw in range(TAP_W):
            cols.append(x_pad[th:th + qh, tw:tw + qw, :])             # (qh, qw, C_IN)
    x_col = jnp.concatenate(cols, axis=-1).reshape(qh * qw, K_DIM)

    n_rows = qh * qw
    # K padding: one column of ones (bias hook) + zeros up to K_PAD lanes.
    x_col = jnp.concatenate(
        [x_col,
         jnp.ones((n_rows, 1), jnp.float32),
         jnp.zeros((n_rows, K_PAD - K_DIM - 1), jnp.float32)], axis=-1)

    # M padding to a multiple of the tile (and of the 8-row sublane granularity).
    tm = min(TM_MAX, ((n_rows + 7) // 8) * 8)
    n_blocks = pl.cdiv(n_rows, tm)
    padded_rows = n_blocks * tm
    x_col = jnp.pad(x_col, ((0, padded_rows - n_rows), (0, 0))).astype(compute_dtype)

    kernel = functools.partial(_fused_kernel, min_v=min_value, max_v=max_value)
    itemsize = jnp.dtype(compute_dtype).itemsize
    bytes_accessed = (padded_rows * K_PAD * itemsize          # X_col
                      + K_PAD * N_PAD * itemsize              # weights (resident)
                      + padded_rows * N_PAD * 4)              # f32 output
    res = pl.pallas_call(
        kernel,
        out_shape=jax.ShapeDtypeStruct((padded_rows, N_PAD), jnp.float32),
        grid=(n_blocks,),
        in_specs=[
            pl.BlockSpec((tm, K_PAD), lambda i: (i, 0)),
            pl.BlockSpec((K_PAD, N_PAD), lambda i: (0, 0)),   # weights stay resident
        ],
        out_specs=pl.BlockSpec((tm, N_PAD), lambda i: (i, 0)),
        compiler_params=pltpu.CompilerParams(
            dimension_semantics=("parallel",)),
        cost_estimate=pl.CostEstimate(
            flops=2 * padded_rows * K_PAD * N_PAD,
            transcendentals=0,
            bytes_accessed=bytes_accessed),
    )(x_col, w_ext)

    # col2im as a single transpose: (qh, qw, ph, pw, co) -> (co, qh, ph, qw, pw)
    out = res[:n_rows, :N_DIM].reshape(qh, qw, SH, SW, C_OUT)
    out = jnp.transpose(out, (4, 0, 2, 1, 3)).reshape(C_OUT, SH * qh, SW * qw)
    return out[None, :, :oh, :ow]


def reference_conv(x_nchw, w_t, bias):
    """Pure-JAX reference for the same ConvTranspose2d (pre-clamp)."""
    rhs = jnp.transpose(w_t[:, :, ::-1, ::-1], (1, 0, 2, 3))   # (C_OUT, C_IN, KH, KW)
    out = lax.conv_general_dilated(
        x_nchw.astype(jnp.float32), rhs.astype(jnp.float32),
        window_strides=(1, 1),
        padding=((KH - 1 - PH, KH - 1 - PH), (KW - 1 - PW, KW - 1 - PW)),
        lhs_dilation=(SH, SW), rhs_dilation=(1, 1),
        dimension_numbers=("NCHW", "OIHW", "NCHW"))
    return out + bias.reshape(1, C_OUT, 1, 1)


if __name__ == "__main__":
    key = jax.random.PRNGKey(0)
    kx, kw_, kb = jax.random.split(key, 3)

    # Spec input size: (1, 22, 51, 51); channels fixed by the module weights.
    H_IN = W_IN = 51
    x = jax.random.normal(kx, (1, C_IN, H_IN, W_IN), jnp.float32)

    bound = 1.0 / math.sqrt(C_OUT * KH * KW)
    w_t = jax.random.uniform(kw_, (C_IN, C_OUT, KH, KW), jnp.float32, -bound, bound)
    bias = jax.random.uniform(kb, (C_OUT,), jnp.float32, -bound, bound)

    oh = (H_IN - 1) * SH - 2 * PH + KH
    ow = (W_IN - 1) * SW - 2 * PW + KW
    ref_raw = reference_conv(x, w_t, bias)
    ref = jnp.clip(ref_raw, MIN_V, MAX_V)

    # --- f32 path: validates the phase/tap packing + bias fold exactly ---
    w_f32 = pack_params(w_t, bias, compute_dtype=jnp.float32)
    out_f32 = jax.block_until_ready(conv_transpose_clamp(x, w_f32))
    assert out_f32.shape == (1, C_OUT, oh, ow), out_f32.shape
    np.testing.assert_allclose(np.asarray(out_f32), np.asarray(ref),
                               rtol=1e-5, atol=1e-3)
    out_f32_raw = jax.block_until_ready(
        conv_transpose_clamp(x, w_f32, min_value=-1e30, max_value=1e30))
    np.testing.assert_allclose(np.asarray(out_f32_raw), np.asarray(ref_raw),
                               rtol=1e-3, atol=5e-3)

    # --- bf16 path (default / production): half the HBM traffic, native MXU rate ---
    w_bf16 = pack_params(w_t, bias)                           # bfloat16
    out_bf16 = jax.block_until_ready(conv_transpose_clamp(x, w_bf16))
    assert out_bf16.shape == (1, C_OUT, oh, ow), out_bf16.shape
    # Clamp floor saturates random-scale inputs, so the clamped outputs match tightly.
    np.testing.assert_allclose(np.asarray(out_bf16), np.asarray(ref),
                               rtol=1e-4, atol=1.0)
    out_bf16_raw = jax.block_until_ready(
        conv_transpose_clamp(x, w_bf16, min_value=-1e30, max_value=1e30))
    np.testing.assert_allclose(np.asarray(out_bf16_raw), np.asarray(ref_raw),
                               rtol=2e-2, atol=1e-2)

    print("KERNEL_OK")
</pallas_src>

<mosaic_0001>
module attributes {stable_mosaic.version = 11 : i64} {
  func.func @_fused_kernel(%arg0: i32, %arg1: memref<256x384xf32, #tpu.memory_space<vmem>>, %arg2: memref<384x512xf32, #tpu.memory_space<vmem>>, %arg3: memref<256x512xf32, #tpu.memory_space<vmem>>) attributes {dimension_semantics = [#tpu.dimension_semantics<parallel>], iteration_bounds = array<i64: 10>, scalar_prefetch = 0 : i64, scratch_operands = 0 : i64, tpu.core_type = #tpu.core_type<tc>, window_params = [{transform_indices = @transform_0, window_bounds = array<i64: 256, 384>}, {pipeline_mode = #tpu.pipeline_mode<synchronous>, transform_indices = @transform_1, window_bounds = array<i64: 384, 512>}, {transform_indices = @transform_2, window_bounds = array<i64: 256, 512>}]} {
    %c0 = arith.constant 0 : index
    %c0_0 = arith.constant 0 : index
    %0 = vector.load %arg1[%c0, %c0_0] : memref<256x384xf32, #tpu.memory_space<vmem>>, vector<256x384xf32>
    %c0_1 = arith.constant 0 : index
    %c0_2 = arith.constant 0 : index
    %1 = vector.load %arg2[%c0_1, %c0_2] : memref<384x512xf32, #tpu.memory_space<vmem>>, vector<384x512xf32>
    %cst = arith.constant dense<0.000000e+00> : vector<256x512xf32>
    %2 = tpu.matmul %0, %1, %cst {dimension_numbers = #tpu.dot_dimension_numbers<[1], [0], [0], [1], [0, 0, 1, 1], [], []>} : vector<256x384xf32>, vector<384x512xf32>, vector<256x512xf32> -> vector<256x512xf32>
    %cst_3 = arith.constant 1.596200e+05 : f32
    %cst_4 = arith.constant 5.462180e+05 : f32
    %3 = vector.broadcast %cst_3 : f32 to vector<256x512xf32>
    %4 = arith.maximumf %3, %2 : vector<256x512xf32>
    %5 = vector.broadcast %cst_4 : f32 to vector<256x512xf32>
    %6 = arith.minimumf %5, %4 : vector<256x512xf32>
    %c0_5 = arith.constant 0 : index
    %c0_6 = arith.constant 0 : index
    %7 = vector.load %arg3[%c0_5, %c0_6] : memref<256x512xf32, #tpu.memory_space<vmem>>, vector<256x512xf32>
    tpu.vector_store %arg3[%c0_5, %c0_6], %6 {strides = array<i32>} : memref<256x512xf32, #tpu.memory_space<vmem>>, vector<256x512xf32>,
    return
  }
  func.func @transform_0(%arg0: i32) -> (i32, i32) {
    %c0_i32 = arith.constant 0 : i32
    %c0_i32_0 = arith.constant 0 : i32
    return %arg0, %c0_i32 : i32, i32
  }
  func.func @transform_1(%arg0: i32) -> (i32, i32) {
    %c0_i32 = arith.constant 0 : i32
    %c0_i32_0 = arith.constant 0 : i32
    %c0_i32_1 = arith.constant 0 : i32
    return %c0_i32, %c0_i32_0 : i32, i32
  }
  func.func @transform_2(%arg0: i32) -> (i32, i32) {
    %c0_i32 = arith.constant 0 : i32
    %c0_i32_0 = arith.constant 0 : i32
    return %arg0, %c0_i32 : i32, i32
  }
}

</mosaic_0001>

<bundles_post_ra>
// kernel: tpu_custom_call.1
= control target key start
LH: loop header
LB: loop body
LE: loop exit
PB: predicated region body
PF: predicated region fallthrough
CT: control target
= control target key end

     0   :  { %7 = vsyncpa [#allocation3], 0  ;;  %s3024_s0 = inlined_call_operand.hbm [shape: f32[2560,384], index: 0, kind: input, shape index: {}]   ;;  %s3025_s1 = inlined_call_operand.hbm [shape: f32[384,512], index: 1, kind: input, shape index: {}]   ;;  %s3026_s2 = inlined_call_operand.hbm [shape: f32[2560,512], index: 2, kind: output, shape index: {}]  }
   0x1   :  { %9 = vsyncpa [#allocation3 + $0x1], 0 }
   0x2   :  { %10 = vsyncpa [#allocation6], 0 }
   0x3   :  { %11 = vsyncpa [#allocation4], 0 }
   0x4   :  { %13 = vsyncpa [#allocation4 + $0x1], 0  ;;  %s2538_s9 = smov 0   ;;  %s2540_s10 = smov 0  }
   0x5   :  { %s2542_s11 = smov 0   ;;  %s2544_s12 = smov 0  }
   0x6 LB: > { %s2559_s13 = sadd.s32 4294967295, %s2511_s12   ;;  %s1978_s14 = sadd.s32 4294967294, %s2511_s12   ;;  %s2511_s12 = sphi %s2544_s12, %s3045_s12   ;;  %s2507_s11 = sphi %s2542_s11, %s3044_s11   ;;  %s2503_s10 = sphi %s2540_s10, %s3043_s10   ;;  %s2499_s9 = sphi %s2538_s9, %s3042_s9  }
   0x7   : > { %p39_p0 = scmp.ne.s32.totalorder %s2503_s10, %s2499_s9  ;;  %p3027_p1 = scmp.eq.s32.totalorder %s2559_s13, 0 }
   0x8   : > { %p90_p3 = scmp.eq.s32.totalorder %s1978_s14, 9  ;;  %p1979_p5 = scmp.ge.s32.totalorder %s2511_s12, 1 }
   0x9   : > { %p2568_p4 = por %p3027_p1, %p39_p0  ;;  %p97_p7 = scmp.lt.s32.totalorder %s2511_s12, 11 }
   0xa   : > { %p2573_p6 = por %p90_p3, %p39_p0  ;;  %s2513_s18 = smov [#allocation5]  }
   0xb   : > { %s3030_s15 = scalar_select %p2568_p4, 1, 0 }
   0xc   : > { %s3031_s16 = scalar_select %p2573_p6, 1, 0 }
   0xd   : > { %p2578_p8 = pnand %p1979_p5, %p97_p7  ;;  %s109_s19 = sshll.u32 %s2513_s18, 4  ;;  %s110_s19 = int_to_ptr.vmem [resolvable:$true] %s109_s19 }
   0xe   : > { %s2591_s21 = sadd.s32 1, %s2511_s12   ;;  %s26_s22 = sadd.s32 1, %s2507_s11 }
   0xf   : > { %s3032_s17 = scalar_select %p2578_p8, 1, 0 }
  0x10   : > { %p2327_p9 = pneg %p2578_p8  ;;  %s23_s23 = ssub.s32 %s2511_s12, %s2591_s21 }
  0x11   : > { %s2383_s26 = scalar_lea.hbm %s3025_s1, 24576 }
  0x12   : > { %p2586_p10 = pnand %p2327_p9, %p3027_p1  ;;  %p2384_p11 = scmp.ne.s32.totalorder %s3025_s1, %s2383_s26 }
  0x13   : > { %p2390_p3 = scmp.lt.u32.totalorder %s2383_s26, %s3025_s1 }
  0x14   : > { %p2385_p12 = pneg %p2586_p10 }
  0x16   : > { %p2386_p13 = pnand %p2385_p12, %p2384_p11 }
  0x18   : > { %p2387_p0 = pneg %p2386_p13 }
  0x1a   : > { %p2392_p5 = pnand %p2390_p3, %p2387_p0 }
  0x1c   : > { %2395 = shalt.err (!%p2392_p5)
}
  0x1d   : > { %s2396_s3 = scalar_lea.vmem %s110_s19, 24576  ;;  %p2404_p2 = scmp.lt.s32.totalorder %s110_s19, %s110_s19 }
  0x1e   : > { %p2397_p7 = scmp.ne.s32.totalorder %s110_s19, %s2396_s3  ;;  %p2405_p6 = scmp.lt.s32.totalorder %s2396_s3, %s2396_s3 }
  0x20   : > { %p2399_p9 = pnand %p2397_p7, %p2385_p12  ;;  %p2406_p4 = por %p2405_p6, %p2404_p2 }
  0x22   : > { %p2400_p1 = pneg %p2399_p9 }
  0x24   : > { %p2407_p8 = pnand %p2406_p4, %p2400_p1 }
  0x26   : > { %2410 = shalt.err (!%p2407_p8)
}
  0x27   : > { %s2514_s4 = smov 512   ;;  %s2515_s5 = smov 32  }
  0x28   : > { %2330 = dma.hbm_to_vmem [thread:$0]  (!%p2586_p10), %s3025_s1, 24576, %s110_s19, [#allocation6], %s2514_s4, %s2514_s4, %s2515_s5  }
  0x29   : > { %p24_p11 = scmp.eq.s32.totalorder %s23_s23, 0  ;;  %p33_p2 = scmp.ne.s32.totalorder %s2507_s11, %s2503_s10 }
  0x2a   : > { %p34_p1 = scmp.eq.s32.totalorder %s2511_s12, 0  ;;  %p2340_p4 = scmp.lt.s32.totalorder %s2511_s12, 10 }
  0x2b   : > { %s2617_s8 = scalar_select %p24_p11, %s2507_s11, %s26_s22  }
  0x2c   : > { %p35_p6 = por %p34_p1, %p33_p2  ;;  %p3034_p8 = scmp.eq.s32.totalorder %s2559_s13, 9 }
  0x2d   : > { %s123_s18 = sand.u32 1, %s2507_s11   ;;  %s2317_s24 = smul.u32 12288, %s2511_s12 }
  0x2e   : > { %p2621_p12 = por %p3034_p8, %p33_p2  ;;  %s2316_s25 = smul.u32 768, %s123_s18 }
  0x2f   : > { %s2630_s27 = scalar_lea.hbm %s3024_s0, %s2317_s24  ;;  %p2632_p10 = pnand %p2340_p4, %p35_p6 }
  0x30   : > { %s127_s22 = scalar_lea.vmem [#allocation2], %s2316_s25  ;;  %s2638_s28 = scalar_lea.sflag [#allocation3], %s123_s18 }
  0x31   : > { %s135_s23 = sshll.u32 %s127_s22, 4  ;;  %s2411_s29 = scalar_lea.hbm %s2630_s27, 12288  ;;  %s2636_s23 = int_to_ptr.vmem [resolvable:$true] %s135_s23 }
  0x32   : > { %p2412_p13 = scmp.ne.s32.totalorder %s2630_s27, %s2411_s29  ;;  %p2413_p0 = pneg %p2632_p10 }
  0x33   : > { %s2416_s4 = scalar_lea.hbm %s3024_s0, 122880  ;;  %p2417_p7 = scmp.lt.u32.totalorder %s2630_s27, %s3024_s0 }
  0x34   : > { %p2414_p3 = pnand %p2413_p0, %p2412_p13  ;;  %p2418_p9 = scmp.lt.u32.totalorder %s2416_s4, %s2411_s29 }
  0x35   : > { %p2420_p2 = scmp.lt.u32.totalorder %s2411_s29, %s2630_s27 }
  0x36   : > { %p2415_p5 = pneg %p2414_p3  ;;  %p2419_p11 = por %p2418_p9, %p2417_p7 }
  0x38   : > { %p2421_p1 = por %p2420_p2, %p2419_p11 }
  0x3a   : > { %p2422_p4 = pnand %p2421_p1, %p2415_p5 }
  0x3c   : > { %2425 = shalt.err (!%p2422_p4)
}
  0x3d   : > { %s2426_s7 = scalar_lea.vmem %s2636_s23, 12288  ;;  %s2516_s18 = smov [#allocation2]  }
  0x3e   : > { %p2427_p6 = scmp.ne.s32.totalorder %s2636_s23, %s2426_s7  ;;  %s2431_s24 = sshll.u32 %s2516_s18, 4  ;;  %s2432_s24 = int_to_ptr.vmem [resolvable:$false] %s2431_s24 }
  0x3f   : > { %s2433_s25 = scalar_lea.vmem %s2432_s24, 24576  ;;  %p2434_p3 = scmp.lt.s32.totalorder %s2636_s23, %s2432_s24 }
  0x40   : > { %p2429_p8 = pnand %p2427_p6, %p2413_p0  ;;  %p2435_p7 = scmp.lt.s32.totalorder %s2433_s25, %s2426_s7 }
  0x42   : > { %p2430_p13 = pneg %p2429_p8  ;;  %p2436_p9 = por %p2435_p7, %p2434_p3 }
  0x44   : > { %p2437_p11 = pnand %p2436_p9, %p2430_p13 }
  0x46   : > { %2440 = shalt.err (!%p2437_p11)
}
  0x47   : > { %s2517_s20 = smov 384   ;;  %s2518_s26 = smov 24  }
  0x48   : > { %2334 = dma.hbm_to_vmem [thread:$0]  (!%p2632_p10), %s2630_s27, 12288, %s2636_s23, %s2638_s28, %s2517_s20, %s2517_s20, %s2518_s26  }
  0x49   : > { %p3037_p0 = scmp.ne.s32.totalorder %s3032_s17, 0 }
  0x4a   : > { %s2669_s22 = sand.u32 (!%p3037_p0), 1, %s2503_s10   ;;  %p3038_p5 = scmp.ne.s32.totalorder (!%p3037_p0), %s3030_s15, 0 }
  0x4b   : > { %147 = sbr.rel (%p3037_p0) target bundleno = 641 (0x281), region = 28  ;;  %s150_s30 = scalar_lea.sflag (!%p3037_p0), [#allocation3], %s2669_s22 }
  0x4c   : > { %s2318_s29 = smul.u32 (!%p3037_p0), 768, %s2669_s22 }
  0x4e   : > { %s2673_s3 = scalar_lea.vmem (!%p3037_p0), [#allocation2], %s2318_s29 }
  0x52   : > { %2486 = dma.done.wait (%p3038_p5), %s150_s30, 12288  }
  0x53   : > { %2488 = vsyncadd (%p3038_p5), %s150_s30, 4294955008  ;;  %p3039_p10 = scmp.eq.s32.totalorder %s2559_s13, 0 }
  0x55   : > { %2490 = dma.done.wait (%p3039_p10), [#allocation6], 24576   ;;  %p3040_p2 = pmov %p3039_p10 }
  0x56   : > { %v277_v0 = vld [vmem:[#allocation5 + $0x8] sm:$0xff]  ;;  %v279_v2 = vld [vmem:[#allocation5 + $0x18] sm:$0xff]  ;;  %v276_v5 = vld [vmem:[#allocation5] sm:$0xff]  ;;  %s1987_s15 = sshll.u32 %s2669_s22, 10  ;;  %s1995_s27 = sshll.u32 %s2559_s13, 14 }
  0x57   : > { %2492 = vsyncadd (%p3040_p2), [#allocation6], 4294942720  ;;  %v281_v1 = vld [vmem:[#allocation5 + $0x28] sm:$0xff]  ;;  %v283_v4 = vld [vmem:[#allocation5 + $0x38] sm:$0xff]  ;;  %s2844_s17 = scalar_lea.vmem [#allocation7], %s1987_s15  ;;  %s2975_s28 = scalar_lea.hbm %s3026_s2, %s1995_s27 }
  0x58   : > { %v1996_v3 = vpack.c.bf16 %v281_v1, %v277_v0  ;;  %v280_v6 = vld [vmem:[#allocation5 + $0x20] sm:$0xff]  ;;  %v2092_v7 = vpack.c.bf16 %v283_v4, %v279_v2  ;;  %v278_v9 = vld [vmem:[#allocation5 + $0x10] sm:$0xff]  ;;  %v285_v11 = vld [vmem:[#allocation5 + $0x48] sm:$0xff]  ;;  %s1895_s19 = sshll.u32 %s2844_s17, 4  ;;  %s1881_s4 = scalar_lea.sflag [#allocation4], %s2669_s22  ;;  %s2977_s19 = int_to_ptr.vmem [resolvable:$true] %s1895_s19 }
  0x59   : > { %v1998_v8 = vpack.c.bf16 %v280_v6, %v276_v5  ;;  %v282_v10 = vld [vmem:[#allocation5 + $0x30] sm:$0xff]  ;;  %v289_v13 = vld [vmem:[#allocation5 + $0x68] sm:$0xff]  ;;  %v287_v14 = vld [vmem:[#allocation5 + $0x58] sm:$0xff]  ;;  %s2441_s5 = scalar_lea.vmem %s2977_s19, 16384  ;;  %s2520_s6 = smov [#allocation7]  }
  0x5a   : > { %1997 = vmatprep.subr.bf16.mxu0 %v1996_v3  ;;  %v2094_v12 = vpack.c.bf16 %v282_v10, %v278_v9  ;;  %v291_v15 = vld [vmem:[#allocation5 + $0x78] sm:$0xff]  ;;  %2093 = vmatprep.subr.bf16.mxu1 %v2092_v7  ;;  %v2000_v16 = vpack.c.bf16 %v289_v13, %v285_v11  ;;  %v284_v18 = vld [vmem:[#allocation5 + $0x40] sm:$0xff]  ;;  %v286_v20 = vld [vmem:[#allocation5 + $0x50] sm:$0xff]  ;;  %p2442_p1 = scmp.ne.s32.totalorder %s2977_s19, %s2441_s5  ;;  %s2445_s7 = sshll.u32 %s2520_s6, 4  ;;  %s2446_s7 = int_to_ptr.vmem [resolvable:$false] %s2445_s7 }
  0x5b   : > { %1999 = vmatpush1.bf16.msra.mxu0 %v1998_v8  ;;  %v2096_v17 = vpack.c.bf16 %v291_v15, %v287_v14  ;;  %v288_v19 = vld [vmem:[#allocation5 + $0x60] sm:$0xff]  ;;  %v290_v22 = vld [vmem:[#allocation5 + $0x70] sm:$0xff]  ;;  %v293_v23 = vld [vmem:[#allocation5 + $0x88] sm:$0xff]  ;;  %s2447_s18 = scalar_lea.vmem %s2446_s7, 32768  ;;  %p2448_p8 = scmp.lt.s32.totalorder %s2977_s19, %s2446_s7 }
  0x5c   : > { %2095 = vmatpush1.bf16.msra.mxu1 %v2094_v12  ;;  %v2002_v21 = vpack.c.bf16 %v288_v19, %v284_v18  ;;  %v297_v24 = vld [vmem:[#allocation5 + $0xa8] sm:$0xff]  ;;  %2001 = vmatprep.subr.bf16.mxu0 %v2000_v16  ;;  %v2098_v25 = vpack.c.bf16 %v290_v22, %v286_v20  ;;  %v295_v27 = vld [vmem:[#allocation5 + $0x98] sm:$0xff]  ;;  %v292_v29 = vld [vmem:[#allocation5 + $0x80] sm:$0xff]  ;;  %p2443_p4 = pnand %p2442_p1, %p2621_p12  ;;  %p2449_p13 = scmp.lt.s32.totalorder %s2447_s18, %s2441_s5 }
  0x5d   : > { %2097 = vmatprep.subr.bf16.mxu1 %v2096_v17  ;;  %v2004_v26 = vpack.c.bf16 %v297_v24, %v293_v23  ;;  %v299_v28 = vld [vmem:[#allocation5 + $0xb8] sm:$0xff]  ;;  %v296_v31 = vld [vmem:[#allocation5 + $0xa0] sm:$0xff]  ;;  %v294_v32 = vld [vmem:[#allocation5 + $0x90] sm:$0xff] }
  0x5e   : > { %v2100_v30 = vpack.c.bf16 %v299_v28, %v295_v27  ;;  %v298_v33 = vld [vmem:[#allocation5 + $0xb0] sm:$0xff]  ;;  %v2006_v34 = vpack.c.bf16 %v296_v31, %v292_v29  ;;  %v301_v35 = vld [vmem:[#allocation5 + $0xc8] sm:$0xff]  ;;  %v303_v37 = vld [vmem:[#allocation5 + $0xd8] sm:$0xff]  ;;  %p2444_p6 = pneg %p2443_p4  ;;  %p2450_p3 = por %p2449_p13, %p2448_p8 }
  0x5f   : > { %2003 = vmatpush1.bf16.msra.mxu0 %v2002_v21  ;;  %v305_v36 = vld [vmem:[#allocation5 + $0xe8] sm:$0xff]  ;;  %v2102_v38 = vpack.c.bf16 %v298_v33, %v294_v32  ;;  %v307_v40 = vld [vmem:[#allocation5 + $0xf8] sm:$0xff]  ;;  %v300_v41 = vld [vmem:[#allocation5 + $0xc0] sm:$0xff] }
  0x60   : > { %2099 = vmatpush1.bf16.msra.mxu1 %v2098_v25  ;;  %2005 = vmatprep.subr.bf16.mxu0 %v2004_v26  ;;  %v2008_v39 = vpack.c.bf16 %v305_v36, %v301_v35  ;;  %v304_v42 = vld [vmem:[#allocation5 + $0xe0] sm:$0xff]  ;;  %v2104_v43 = vpack.c.bf16 %v307_v40, %v303_v37  ;;  %v302_v44 = vld [vmem:[#allocation5 + $0xd0] sm:$0xff]  ;;  %v309_v46 = vld [vmem:[#allocation5 + $0x108] sm:$0xff]  ;;  %p2451_p7 = pnand %p2450_p3, %p2444_p6 }
  0x61   : > { %2101 = vmatprep.subr.bf16.mxu1 %v2100_v30  ;;  %v306_v45 = vld [vmem:[#allocation5 + $0xf0] sm:$0xff]  ;;  %v313_v47 = vld [vmem:[#allocation5 + $0x128] sm:$0xff]  ;;  %v311_v48 = vld [vmem:[#allocation5 + $0x118] sm:$0xff]  ;;  %v2010_v50 = vpack.c.bf16 %v304_v42, %v300_v41 }
  0x62   : > { %v315_v49 = vld [vmem:[#allocation5 + $0x138] sm:$0xff]  ;;  %v2106_v51 = vpack.c.bf16 %v306_v45, %v302_v44  ;;  %v2012_v52 = vpack.c.bf16 %v313_v47, %v309_v46  ;;  %v308_v53 = vld [vmem:[#allocation5 + $0x100] sm:$0xff]  ;;  %v310_v55 = vld [vmem:[#allocation5 + $0x110] sm:$0xff] }
  0x63   : > { %2007 = vmatpush1.bf16.msra.mxu0 %v2006_v34  ;;  %v312_v54 = vld [vmem:[#allocation5 + $0x120] sm:$0xff]  ;;  %v2108_v56 = vpack.c.bf16 %v315_v49, %v311_v48  ;;  %v314_v57 = vld [vmem:[#allocation5 + $0x130] sm:$0xff]  ;;  %v317_v58 = vld [vmem:[#allocation5 + $0x148] sm:$0xff] }
  0x64   : > { %2103 = vmatpush1.bf16.msra.mxu1 %v2102_v38  ;;  %2009 = vmatprep.subr.bf16.mxu0 %v2008_v39  ;;  %v321_v59 = vld [vmem:[#allocation5 + $0x168] sm:$0xff]  ;;  %v319_v60 = vld [vmem:[#allocation5 + $0x158] sm:$0xff]  ;;  %v2014_v62 = vpack.c.bf16 %v312_v54, %v308_v53  ;;  %v2110_v63 = vpack.c.bf16 %v314_v57, %v310_v55  ;;  %v316_v1 = vld [vmem:[#allocation5 + $0x140] sm:$0xff] }
  0x65   : > { %2105 = vmatprep.subr.bf16.mxu1 %v2104_v43  ;;  %v323_v61 = vld [vmem:[#allocation5 + $0x178] sm:$0xff]  ;;  %v2016_v0 = vpack.c.bf16 %v321_v59, %v317_v58  ;;  %v320_v2 = vld [vmem:[#allocation5 + $0x160] sm:$0xff]  ;;  %v318_v3 = vld [vmem:[#allocation5 + $0x150] sm:$0xff] }
  0x66   : > { %v2112_v4 = vpack.c.bf16 %v323_v61, %v319_v60  ;;  %v322_v5 = vld [vmem:[#allocation5 + $0x170] sm:$0xff]  ;;  %v325_v6 = vld [vmem:[#allocation5 + $0x188] sm:$0xff]  ;;  %v327_v8 = vld [vmem:[#allocation5 + $0x198] sm:$0xff]  ;;  %v2018_v10 = vpack.c.bf16 %v320_v2, %v316_v1 }
  0x67   : > { %2011 = vmatpush1.bf16.msra.mxu0 %v2010_v50  ;;  %v329_v7 = vld [vmem:[#allocation5 + $0x1a8] sm:$0xff]  ;;  %v331_v9 = vld [vmem:[#allocation5 + $0x1b8] sm:$0xff]  ;;  %v2114_v11 = vpack.c.bf16 %v322_v5, %v318_v3  ;;  %v324_v13 = vld [vmem:[#allocation5 + $0x180] sm:$0xff] }
  0x68   : > { %2107 = vmatpush1.bf16.msra.mxu1 %v2106_v51  ;;  %2013 = vmatprep.subr.bf16.mxu0 %v2012_v52  ;;  %v2020_v12 = vpack.c.bf16 %v329_v7, %v325_v6  ;;  %v328_v14 = vld [vmem:[#allocation5 + $0x1a0] sm:$0xff]  ;;  %v326_v15 = vld [vmem:[#allocation5 + $0x190] sm:$0xff]  ;;  %v2116_v16 = vpack.c.bf16 %v331_v9, %v327_v8  ;;  %v333_v18 = vld [vmem:[#allocation5 + $0x1c8] sm:$0xff] }
  0x69   : > { %2109 = vmatprep.subr.bf16.mxu1 %v2108_v56  ;;  %v330_v17 = vld [vmem:[#allocation5 + $0x1b0] sm:$0xff]  ;;  %v337_v19 = vld [vmem:[#allocation5 + $0x1e8] sm:$0xff]  ;;  %v335_v20 = vld [vmem:[#allocation5 + $0x1d8] sm:$0xff]  ;;  %v2022_v22 = vpack.c.bf16 %v328_v14, %v324_v13 }
  0x6a   : > { %v339_v21 = vld [vmem:[#allocation5 + $0x1f8] sm:$0xff]  ;;  %v2118_v23 = vpack.c.bf16 %v330_v17, %v326_v15  ;;  %v2024_v24 = vpack.c.bf16 %v337_v19, %v333_v18  ;;  %v332_v25 = vld [vmem:[#allocation5 + $0x1c0] sm:$0xff]  ;;  %v334_v27 = vld [vmem:[#allocation5 + $0x1d0] sm:$0xff] }
  0x6b   : > { %2015 = vmatpush1.bf16.msra.mxu0 %v2014_v62  ;;  %v336_v26 = vld [vmem:[#allocation5 + $0x1e0] sm:$0xff]  ;;  %v2120_v28 = vpack.c.bf16 %v339_v21, %v335_v20  ;;  %v338_v29 = vld [vmem:[#allocation5 + $0x1f0] sm:$0xff]  ;;  %v341_v30 = vld [vmem:[#allocation5 + $0x208] sm:$0xff] }
  0x6c   : > { %2111 = vmatpush1.bf16.msra.mxu1 %v2110_v63  ;;  %2017 = vmatprep.subr.bf16.mxu0 %v2016_v0  ;;  %v345_v31 = vld [vmem:[#allocation5 + $0x228] sm:$0xff]  ;;  %v343_v32 = vld [vmem:[#allocation5 + $0x218] sm:$0xff]  ;;  %v2026_v34 = vpack.c.bf16 %v336_v26, %v332_v25  ;;  %v2122_v35 = vpack.c.bf16 %v338_v29, %v334_v27  ;;  %v340_v37 = vld [vmem:[#allocation5 + $0x200] sm:$0xff] }
  0x6d   : > { %2113 = vmatprep.subr.bf16.mxu1 %v2112_v4  ;;  %v347_v33 = vld [vmem:[#allocation5 + $0x238] sm:$0xff]  ;;  %v2028_v36 = vpack.c.bf16 %v345_v31, %v341_v30  ;;  %v344_v38 = vld [vmem:[#allocation5 + $0x220] sm:$0xff]  ;;  %v342_v39 = vld [vmem:[#allocation5 + $0x210] sm:$0xff] }
  0x6e   : > { %v2124_v40 = vpack.c.bf16 %v347_v33, %v343_v32  ;;  %v346_v41 = vld [vmem:[#allocation5 + $0x230] sm:$0xff]  ;;  %v349_v42 = vld [vmem:[#allocation5 + $0x248] sm:$0xff]  ;;  %v351_v44 = vld [vmem:[#allocation5 + $0x258] sm:$0xff]  ;;  %v2030_v46 = vpack.c.bf16 %v344_v38, %v340_v37 }
  0x6f   : > { %2019 = vmatpush1.bf16.msra.mxu0 %v2018_v10  ;;  %v353_v43 = vld [vmem:[#allocation5 + $0x268] sm:$0xff]  ;;  %v355_v45 = vld [vmem:[#allocation5 + $0x278] sm:$0xff]  ;;  %v2126_v47 = vpack.c.bf16 %v346_v41, %v342_v39  ;;  %v348_v49 = vld [vmem:[#allocation5 + $0x240] sm:$0xff] }
  0x70   : > { %2115 = vmatpush1.bf16.msra.mxu1 %v2114_v11  ;;  %2021 = vmatprep.subr.bf16.mxu0 %v2020_v12  ;;  %v2032_v48 = vpack.c.bf16 %v353_v43, %v349_v42  ;;  %v352_v50 = vld [vmem:[#allocation5 + $0x260] sm:$0xff]  ;;  %v350_v51 = vld [vmem:[#allocation5 + $0x250] sm:$0xff]  ;;  %v2128_v52 = vpack.c.bf16 %v355_v45, %v351_v44  ;;  %v357_v54 = vld [vmem:[#allocation5 + $0x288] sm:$0xff] }
  0x71   : > { %2117 = vmatprep.subr.bf16.mxu1 %v2116_v16  ;;  %v354_v53 = vld [vmem:[#allocation5 + $0x270] sm:$0xff]  ;;  %v361_v55 = vld [vmem:[#allocation5 + $0x2a8] sm:$0xff]  ;;  %v359_v56 = vld [vmem:[#allocation5 + $0x298] sm:$0xff]  ;;  %v2034_v58 = vpack.c.bf16 %v352_v50, %v348_v49 }
  0x72   : > { %v363_v57 = vld [vmem:[#allocation5 + $0x2b8] sm:$0xff]  ;;  %v2130_v59 = vpack.c.bf16 %v354_v53, %v350_v51  ;;  %v2036_v60 = vpack.c.bf16 %v361_v55, %v357_v54  ;;  %v356_v61 = vld [vmem:[#allocation5 + $0x280] sm:$0xff]  ;;  %v358_v63 = vld [vmem:[#allocation5 + $0x290] sm:$0xff] }
  0x73   : > { %2023 = vmatpush1.bf16.msra.mxu0 %v2022_v22  ;;  %v360_v62 = vld [vmem:[#allocation5 + $0x2a0] sm:$0xff]  ;;  %v2132_v0 = vpack.c.bf16 %v363_v57, %v359_v56  ;;  %v362_v1 = vld [vmem:[#allocation5 + $0x2b0] sm:$0xff]  ;;  %v365_v2 = vld [vmem:[#allocation5 + $0x2c8] sm:$0xff] }
  0x74   : > { %2119 = vmatpush1.bf16.msra.mxu1 %v2118_v23  ;;  %2025 = vmatprep.subr.bf16.mxu0 %v2024_v24  ;;  %v369_v3 = vld [vmem:[#allocation5 + $0x2e8] sm:$0xff]  ;;  %v367_v4 = vld [vmem:[#allocation5 + $0x2d8] sm:$0xff]  ;;  %v2038_v6 = vpack.c.bf16 %v360_v62, %v356_v61  ;;  %v364_v7 = vld [vmem:[#allocation5 + $0x2c0] sm:$0xff]  ;;  %v2134_v8 = vpack.c.bf16 %v362_v1, %v358_v63 }
  0x75   : > { %2121 = vmatprep.subr.bf16.mxu1 %v2120_v28  ;;  %v371_v5 = vld [vmem:[#allocation5 + $0x2f8] sm:$0xff]  ;;  %v2040_v9 = vpack.c.bf16 %v369_v3, %v365_v2  ;;  %v368_v10 = vld [vmem:[#allocation5 + $0x2e0] sm:$0xff]  ;;  %v366_v11 = vld [vmem:[#allocation5 + $0x2d0] sm:$0xff] }
  0x76   : > { %v370_v12 = vld [vmem:[#allocation5 + $0x2f0] sm:$0xff]  ;;  %v2136_v13 = vpack.c.bf16 %v371_v5, %v367_v4  ;;  %v373_v14 = vld [vmem:[#allocation5 + $0x308] sm:$0xff]  ;;  %v375_v17 = vld [vmem:[#allocation5 + $0x318] sm:$0xff]  ;;  %v2042_v19 = vpack.c.bf16 %v368_v10, %v364_v7 }
  0x77   : > { %2027 = vmatpush1.bf16.msra.mxu0 %v2026_v34  ;;  %v377_v15 = vld [vmem:[#allocation5 + $0x328] sm:$0xff]  ;;  %v379_v18 = vld [vmem:[#allocation5 + $0x338] sm:$0xff]  ;;  %v2138_v20 = vpack.c.bf16 %v370_v12, %v366_v11  ;;  %v372_v22 = vld [vmem:[#allocation5 + $0x300] sm:$0xff] }
  0x78   : > { %2123 = vmatpush1.bf16.msra.mxu1 %v2122_v35  ;;  %2029 = vmatprep.subr.bf16.mxu0 %v2028_v36  ;;  %v181_v16 = vld [vmem:[%s2673_s3 + $0x8] sm:$0xff]  ;;  %v2044_v21 = vpack.c.bf16 %v377_v15, %v373_v14  ;;  %v376_v23 = vld [vmem:[#allocation5 + $0x320] sm:$0xff]  ;;  %v374_v24 = vld [vmem:[#allocation5 + $0x310] sm:$0xff]  ;;  %v2140_v25 = vpack.c.bf16 %v379_v18, %v375_v17 }
  0x79   : > { %2125 = vmatprep.subr.bf16.mxu1 %v2124_v40  ;;  %532 = vmatprep.mubr.f32.mxu0 %v181_v16  ;;  %v378_v26 = vld [vmem:[#allocation5 + $0x330] sm:$0xff]  ;;  %v381_v27 = vld [vmem:[#allocation5 + $0x348] sm:$0xff]  ;;  %v383_v29 = vld [vmem:[#allocation5 + $0x358] sm:$0xff]  ;;  %v2046_v31 = vpack.c.bf16 %v376_v23, %v372_v22 }
  0x7a   : > { %1046 = vmatprep.mubr.f32.mxu1 %v181_v16  ;;  %v385_v28 = vld [vmem:[#allocation5 + $0x368] sm:$0xff]  ;;  %v387_v30 = vld [vmem:[#allocation5 + $0x378] sm:$0xff]  ;;  %v2142_v32 = vpack.c.bf16 %v378_v26, %v374_v24  ;;  %v380_v34 = vld [vmem:[#allocation5 + $0x340] sm:$0xff] }
  0x7b   : > { %2031 = vmatpush1.bf16.msra.mxu0 %v2030_v46  ;;  %v2048_v33 = vpack.c.bf16 %v385_v28, %v381_v27  ;;  %v384_v35 = vld [vmem:[#allocation5 + $0x360] sm:$0xff]  ;;  %v382_v36 = vld [vmem:[#allocation5 + $0x350] sm:$0xff]  ;;  %v2144_v37 = vpack.c.bf16 %v387_v30, %v383_v29  ;;  %v389_v39 = vld [vmem:[#allocation5 + $0x388] sm:$0xff] }
  0x7c   : > { %2127 = vmatpush1.bf16.msra.mxu1 %v2126_v47  ;;  %2033 = vmatprep.subr.bf16.mxu0 %v2032_v48  ;;  %v386_v38 = vld [vmem:[#allocation5 + $0x370] sm:$0xff]  ;;  %v393_v40 = vld [vmem:[#allocation5 + $0x3a8] sm:$0xff]  ;;  %v391_v41 = vld [vmem:[#allocation5 + $0x398] sm:$0xff]  ;;  %v2050_v43 = vpack.c.bf16 %v384_v35, %v380_v34 }
  0x7d   : > { %2129 = vmatprep.subr.bf16.mxu1 %v2128_v52  ;;  %v395_v42 = vld [vmem:[#allocation5 + $0x3b8] sm:$0xff]  ;;  %v2146_v44 = vpack.c.bf16 %v386_v38, %v382_v36  ;;  %v2052_v45 = vpack.c.bf16 %v393_v40, %v389_v39  ;;  %v388_v46 = vld [vmem:[#allocation5 + $0x380] sm:$0xff]  ;;  %v390_v48 = vld [vmem:[#allocation5 + $0x390] sm:$0xff] }
  0x7e   : > { %v392_v47 = vld [vmem:[#allocation5 + $0x3a0] sm:$0xff]  ;;  %v2148_v49 = vpack.c.bf16 %v395_v42, %v391_v41  ;;  %v394_v50 = vld [vmem:[#allocation5 + $0x3b0] sm:$0xff]  ;;  %v397_v51 = vld [vmem:[#allocation5 + $0x3c8] sm:$0xff] }
  0x7f   : > { %2035 = vmatpush1.bf16.msra.mxu0 %v2034_v58  ;;  %v401_v52 = vld [vmem:[#allocation5 + $0x3e8] sm:$0xff]  ;;  %v399_v53 = vld [vmem:[#allocation5 + $0x3d8] sm:$0xff]  ;;  %v2054_v55 = vpack.c.bf16 %v392_v47, %v388_v46  ;;  %v2150_v56 = vpack.c.bf16 %v394_v50, %v390_v48  ;;  %v396_v58 = vld [vmem:[#allocation5 + $0x3c0] sm:$0xff] }
  0x80   : > { %2131 = vmatpush1.bf16.msra.mxu1 %v2130_v59  ;;  %2037 = vmatprep.subr.bf16.mxu0 %v2036_v60  ;;  %v403_v54 = vld [vmem:[#allocation5 + $0x3f8] sm:$0xff]  ;;  %v2056_v57 = vpack.c.bf16 %v401_v52, %v397_v51  ;;  %v400_v59 = vld [vmem:[#allocation5 + $0x3e0] sm:$0xff]  ;;  %v398_v60 = vld [vmem:[#allocation5 + $0x3d0] sm:$0xff] }
  0x81   : > { %2133 = vmatprep.subr.bf16.mxu1 %v2132_v0  ;;  %v2152_v61 = vpack.c.bf16 %v403_v54, %v399_v53  ;;  %v402_v62 = vld [vmem:[#allocation5 + $0x3f0] sm:$0xff]  ;;  %v405_v63 = vld [vmem:[#allocation5 + $0x408] sm:$0xff]  ;;  %v407_v1 = vld [vmem:[#allocation5 + $0x418] sm:$0xff]  ;;  %v2058_v3 = vpack.c.bf16 %v400_v59, %v396_v58 }
  0x82   : > { %v409_v0 = vld [vmem:[#allocation5 + $0x428] sm:$0xff]  ;;  %v411_v2 = vld [vmem:[#allocation5 + $0x438] sm:$0xff]  ;;  %v2154_v4 = vpack.c.bf16 %v402_v62, %v398_v60  ;;  %v408_v7 = vld [vmem:[#allocation5 + $0x420] sm:$0xff] }
  0x83   : > { %2039 = vmatpush1.bf16.msra.mxu0 %v2038_v6  ;;  %v2060_v5 = vpack.c.bf16 %v409_v0, %v405_v63  ;;  %v404_v6 = vld [vmem:[#allocation5 + $0x400] sm:$0xff]  ;;  %v410_v10 = vld [vmem:[#allocation5 + $0x430] sm:$0xff]  ;;  %v413_v11 = vld [vmem:[#allocation5 + $0x448] sm:$0xff] }
  0x84   : > { %2135 = vmatpush1.bf16.msra.mxu1 %v2134_v8  ;;  %2041 = vmatprep.subr.bf16.mxu0 %v2040_v9  ;;  %v2156_v8 = vpack.c.bf16 %v411_v2, %v407_v1  ;;  %v406_v9 = vld [vmem:[#allocation5 + $0x410] sm:$0xff]  ;;  %v417_v12 = vld [vmem:[#allocation5 + $0x468] sm:$0xff]  ;;  %v2062_v14 = vpack.c.bf16 %v408_v7, %v404_v6  ;;  %v415_v15 = vld [vmem:[#allocation5 + $0x458] sm:$0xff] }
  0x85   : > { %2137 = vmatprep.subr.bf16.mxu1 %v2136_v13  ;;  %v180_v13 = vld [vmem:[%s2673_s3] sm:$0xff]  ;;  %v419_v16 = vld [vmem:[#allocation5 + $0x478] sm:$0xff]  ;;  %v2158_v17 = vpack.c.bf16 %v410_v10, %v406_v9  ;;  %v414_v22 = vld [vmem:[#allocation5 + $0x450] sm:$0xff] }
  0x86   : > { %v184_v18 = vld [vmem:[%s2673_s3 + $0x20] sm:$0xff]  ;;  %v2160_v23 = vpack.c.bf16 %v419_v16, %v415_v15  ;;  %v418_v24 = vld [vmem:[#allocation5 + $0x470] sm:$0xff]  ;;  %v425_v26 = vld [vmem:[#allocation5 + $0x4a8] sm:$0xff] }
  0x87   : > { %2043 = vmatpush1.bf16.msra.mxu0 %v2042_v19  ;;  %v2064_v19 = vpack.c.bf16 %v417_v12, %v413_v11  ;;  %v183_v27 = vld [vmem:[%s2673_s3 + $0x18] sm:$0xff]  ;;  %v420_v34 = vld [vmem:[#allocation5 + $0x480] sm:$0xff]  ;;  %v422_v36 = vld [vmem:[#allocation5 + $0x490] sm:$0xff] }
  0x88   : > { %2139 = vmatpush1.bf16.msra.mxu1 %v2138_v20  ;;  %2045 = vmatprep.subr.bf16.mxu0 %v2044_v21  ;;  %v412_v20 = vld [vmem:[#allocation5 + $0x440] sm:$0xff]  ;;  %v423_v28 = vld [vmem:[#allocation5 + $0x498] sm:$0xff]  ;;  %v426_v38 = vld [vmem:[#allocation5 + $0x4b0] sm:$0xff] }
  0x89   : > { %2141 = vmatprep.subr.bf16.mxu1 %v2140_v25  ;;  %v416_v21 = vld [vmem:[#allocation5 + $0x460] sm:$0xff]  ;;  %v421_v25 = vld [vmem:[#allocation5 + $0x488] sm:$0xff]  ;;  %v427_v29 = vld [vmem:[#allocation5 + $0x4b8] sm:$0xff]  ;;  %v2166_v46 = vpack.c.bf16 %v426_v38, %v422_v36 }
  0x8a   : > { %v187_v30 = vld [vmem:[%s2673_s3 + $0x38] sm:$0xff]  ;;  %v424_v35 = vld [vmem:[#allocation5 + $0x4a0] sm:$0xff]  ;;  %v429_v39 = vld [vmem:[#allocation5 + $0x4c8] sm:$0xff] }
  0x8b   : > { %2047 = vmatpush1.bf16.msra.mxu0 %v2046_v31  ;;  %v2066_v31 = vpack.c.bf16 %v416_v21, %v412_v20  ;;  %v433_v40 = vld [vmem:[#allocation5 + $0x4e8] sm:$0xff]  ;;  %v186_v41 = vld [vmem:[%s2673_s3 + $0x30] sm:$0xff]  ;;  %v431_v42 = vld [vmem:[#allocation5 + $0x4d8] sm:$0xff] }
  0x8c   : > { %2143 = vmatpush1.bf16.msra.mxu1 %v2142_v32  ;;  %2049 = vmatprep.subr.bf16.mxu0 %v2048_v33  ;;  %v2162_v32 = vpack.c.bf16 %v418_v24, %v414_v22  ;;  %v2068_v33 = vpack.c.bf16 %v425_v26, %v421_v25  ;;  %v2072_v47 = vpack.c.bf16 %v433_v40, %v429_v39  ;;  %v428_v48 = vld [vmem:[#allocation5 + $0x4c0] sm:$0xff]  ;;  %v430_v50 = vld [vmem:[#allocation5 + $0x4d0] sm:$0xff]  ;;  %v437_v53 = vld [vmem:[#allocation5 + $0x508] sm:$0xff] }
  0x8d   : > { %2145 = vmatprep.subr.bf16.mxu1 %v2144_v37  ;;  %v2164_v37 = vpack.c.bf16 %v427_v29, %v423_v28  ;;  %v434_v52 = vld [vmem:[#allocation5 + $0x4f0] sm:$0xff]  ;;  %v441_v54 = vld [vmem:[#allocation5 + $0x528] sm:$0xff]  ;;  %v436_v62 = vld [vmem:[#allocation5 + $0x500] sm:$0xff] }
  0x8e   : > { %v193_v58 = vld [vmem:[%s2673_s3 + $0x68] sm:$0xff]  ;;  %v2170_v60 = vpack.c.bf16 %v434_v52, %v430_v50  ;;  %v440_v63 = vld [vmem:[#allocation5 + $0x520] sm:$0xff]  ;;  %v438_v0 = vld [vmem:[#allocation5 + $0x510] sm:$0xff] }
  0x8f   : > { %2051 = vmatpush1.bf16.msra.mxu0 %v2050_v43  ;;  %v435_v43 = vld [vmem:[#allocation5 + $0x4f8] sm:$0xff]  ;;  %v442_v2 = vld [vmem:[#allocation5 + $0x530] sm:$0xff]  ;;  %v2078_v9 = vpack.c.bf16 %v440_v63, %v436_v62  ;;  %v444_v12 = vld [vmem:[#allocation5 + $0x540] sm:$0xff] }
  0x90   : > { %2147 = vmatpush1.bf16.msra.mxu1 %v2146_v44  ;;  %2053 = vmatprep.subr.bf16.mxu0 %v2052_v45  ;;  %v190_v44 = vld [vmem:[%s2673_s3 + $0x50] sm:$0xff]  ;;  %v2070_v45 = vpack.c.bf16 %v424_v35, %v420_v34  ;;  %v2168_v51 = vpack.c.bf16 %v435_v43, %v431_v42  ;;  %v447_v6 = vld [vmem:[#allocation5 + $0x558] sm:$0xff]  ;;  %v2174_v10 = vpack.c.bf16 %v442_v2, %v438_v0  ;;  %v452_v26 = vld [vmem:[#allocation5 + $0x580] sm:$0xff] }
  0x91   : > { %2149 = vmatprep.subr.bf16.mxu1 %v2148_v49  ;;  %v432_v49 = vld [vmem:[#allocation5 + $0x4e0] sm:$0xff]  ;;  %v451_v7 = vld [vmem:[#allocation5 + $0x578] sm:$0xff]  ;;  %v450_v16 = vld [vmem:[#allocation5 + $0x570] sm:$0xff] }
  0x92   : > { %v2074_v59 = vpack.c.bf16 %v432_v49, %v428_v48  ;;  %v2176_v15 = vpack.c.bf16 %v451_v7, %v447_v6  ;;  %v455_v20 = vld [vmem:[#allocation5 + $0x598] sm:$0xff]  ;;  %v454_v28 = vld [vmem:[#allocation5 + $0x590] sm:$0xff]  ;;  %v460_v40 = vld [vmem:[#allocation5 + $0x5c0] sm:$0xff] }
  0x93   : > { %2055 = vmatpush1.bf16.msra.mxu0 %v2054_v55  ;;  %v189_v55 = vld [vmem:[%s2673_s3 + $0x48] sm:$0xff]  ;;  %v459_v21 = vld [vmem:[#allocation5 + $0x5b8] sm:$0xff]  ;;  %v202_v36 = vld [vmem:[%s2673_s3 + $0xb0] sm:$0xff] }
  0x94   : > { %2151 = vmatpush1.bf16.msra.mxu1 %v2150_v56  ;;  %2057 = vmatprep.subr.bf16.mxu0 %v2056_v57  ;;  %v439_v56 = vld [vmem:[#allocation5 + $0x518] sm:$0xff]  ;;  %v2180_v29 = vpack.c.bf16 %v459_v21, %v455_v20  ;;  %v462_v43 = vld [vmem:[#allocation5 + $0x5d0] sm:$0xff]  ;;  %v204_v49 = vld [vmem:[%s2673_s3 + $0xc0] sm:$0xff] }
  0x95   : > { %2153 = vmatprep.subr.bf16.mxu1 %v2152_v61  ;;  %v443_v57 = vld [vmem:[#allocation5 + $0x538] sm:$0xff]  ;;  %v2076_v61 = vpack.c.bf16 %v441_v54, %v437_v53  ;;  %v208_v50 = vld [vmem:[%s2673_s3 + $0xe0] sm:$0xff]  ;;  %v210_v53 = vld [vmem:[%s2673_s3 + $0xf0] sm:$0xff] }
  0x96   : > { %v2172_v1 = vpack.c.bf16 %v443_v57, %v439_v56  ;;  %v199_v22 = vld [vmem:[%s2673_s3 + $0x98] sm:$0xff]  ;;  %v214_v54 = vld [vmem:[%s2673_s3 + $0x110] sm:$0xff]  ;;  %v217_v56 = vld [vmem:[%s2673_s3 + $0x128] sm:$0xff] }
  0x97   : > { %2059 = vmatpush1.bf16.msra.mxu0 %v2058_v3  ;;  %v445_v3 = vld [vmem:[#allocation5 + $0x548] sm:$0xff]  ;;  %v463_v34 = vld [vmem:[#allocation5 + $0x5d8] sm:$0xff]  ;;  %v216_v57 = vld [vmem:[%s2673_s3 + $0x120] sm:$0xff] }
  0x98   : > { %2155 = vmatpush1.bf16.msra.mxu1 %v2154_v4  ;;  %2061 = vmatprep.subr.bf16.mxu0 %v2060_v5  ;;  %v449_v4 = vld [vmem:[#allocation5 + $0x568] sm:$0xff]  ;;  %v192_v5 = vld [vmem:[%s2673_s3 + $0x60] sm:$0xff]  ;;  %v467_v35 = vld [vmem:[#allocation5 + $0x5f8] sm:$0xff] }
  0x99   : > { %2157 = vmatprep.subr.bf16.mxu1 %v2156_v8  ;;  %v196_v8 = vld [vmem:[%s2673_s3 + $0x80] sm:$0xff]  ;;  %v2080_v11 = vpack.c.bf16 %v449_v4, %v445_v3  ;;  %v2184_v42 = vpack.c.bf16 %v467_v35, %v463_v34  ;;  %v211_v52 = vld [vmem:[%s2673_s3 + $0xf8] sm:$0xff]  ;;  %v226_v62 = vld [vmem:[%s2673_s3 + $0x170] sm:$0xff] }
  0x9a   : > { %533 = vmatmul.mubr.f32.vlgmr.msra.gmra.mrb[0].mxu0 %v180_v13  ;;  %v225_v63 = vld [vmem:[%s2673_s3 + $0x168] sm:$0xff]  ;;  %v232_v2 = vld [vmem:[%s2673_s3 + $0x1a0] sm:$0xff]  ;;  %v231_v3 = vld [vmem:[%s2673_s3 + $0x198] sm:$0xff] }
  0x9b   : > { %1047 = vmatmul.mubr.f32.vlgmr.msra.gmra.mrb[0].mxu1 %v180_v13  ;;  %2063 = vmatpush1.bf16.msra.mxu0 %v2062_v14  ;;  %v448_v13 = vld [vmem:[#allocation5 + $0x560] sm:$0xff]  ;;  %v446_v14 = vld [vmem:[#allocation5 + $0x550] sm:$0xff]  ;;  %v229_v0 = vld [vmem:[%s2673_s3 + $0x188] sm:$0xff] }
  0x9c   : > { %2159 = vmatpush1.bf16.msra.mxu1 %v2158_v17  ;;  %538 = vmatprep.mubr.f32.mxu0 %v184_v18  ;;  %v453_v17 = vld [vmem:[#allocation5 + $0x588] sm:$0xff]  ;;  %v2178_v24 = vpack.c.bf16 %v450_v16, %v446_v14  ;;  %v235_v4 = vld [vmem:[%s2673_s3 + $0x1b8] sm:$0xff]  ;;  %v238_v6 = vld [vmem:[%s2673_s3 + $0x1d0] sm:$0xff] }
  0x9d   : > { %1052 = vmatprep.mubr.f32.mxu1 %v184_v18  ;;  %2065 = vmatprep.subr.bf16.mxu0 %v2064_v19  ;;  %v457_v18 = vld [vmem:[#allocation5 + $0x5a8] sm:$0xff]  ;;  %v195_v19 = vld [vmem:[%s2673_s3 + $0x78] sm:$0xff]  ;;  %v250_v14 = vld [vmem:[%s2673_s3 + $0x230] sm:$0xff] }
  0x9e   : > { %539 = vmatmul.mubr.f32.gmra.mrb[2].mxu0 %v183_v27  ;;  %2161 = vmatprep.subr.bf16.mxu1 %v2160_v23  ;;  %v2082_v23 = vpack.c.bf16 %v448_v13, %v444_v12  ;;  %v2084_v25 = vpack.c.bf16 %v457_v18, %v453_v17  ;;  %v237_v7 = vld [vmem:[%s2673_s3 + $0x1c8] sm:$0xff]  ;;  %v247_v12 = vld [vmem:[%s2673_s3 + $0x218] sm:$0xff]  ;;  %v246_v13 = vld [vmem:[%s2673_s3 + $0x210] sm:$0xff] }
  0x9f   : > { %1053 = vmatmul.mubr.f32.gmra.mrb[2].mxu1 %v183_v27  ;;  %544 = vmatprep.mubr.f32.mxu0 %v187_v30  ;;  %v456_v27 = vld [vmem:[#allocation5 + $0x5a0] sm:$0xff]  ;;  %v253_v16 = vld [vmem:[%s2673_s3 + $0x248] sm:$0xff]  ;;  %v259_v20 = vld [vmem:[%s2673_s3 + $0x278] sm:$0xff] }
  0xa0   : > { %1058 = vmatprep.mubr.f32.mxu1 %v187_v30  ;;  %2067 = vmatpush1.bf16.msra.mxu0 %v2066_v31  ;;  %v458_v30 = vld [vmem:[#allocation5 + $0x5b0] sm:$0xff]  ;;  %v461_v31 = vld [vmem:[#allocation5 + $0x5c8] sm:$0xff]  ;;  %v252_v17 = vld [vmem:[%s2673_s3 + $0x240] sm:$0xff] }
  0xa1   : > { %2163 = vmatpush1.bf16.msra.mxu1 %v2162_v32  ;;  %2069 = vmatprep.subr.bf16.mxu0 %v2068_v33  ;;  %v465_v32 = vld [vmem:[#allocation5 + $0x5e8] sm:$0xff]  ;;  %v198_v33 = vld [vmem:[%s2673_s3 + $0x90] sm:$0xff]  ;;  %v2182_v38 = vpack.c.bf16 %v458_v30, %v454_v28  ;;  %v256_v18 = vld [vmem:[%s2673_s3 + $0x260] sm:$0xff] }
  0xa2   : > { %545 = vmatmul.mubr.f32.gmra.mrb[4].mxu0 %v186_v41  ;;  %2165 = vmatprep.subr.bf16.mxu1 %v2164_v37  ;;  %v2086_v37 = vpack.c.bf16 %v456_v27, %v452_v26  ;;  %v2088_v39 = vpack.c.bf16 %v465_v32, %v461_v31  ;;  %v258_v21 = vld [vmem:[%s2673_s3 + $0x270] sm:$0xff]  ;;  %v268_v26 = vld [vmem:[%s2673_s3 + $0x2c0] sm:$0xff]  ;;  %v267_v27 = vld [vmem:[%s2673_s3 + $0x2b8] sm:$0xff]  ;;  %v2519_v32 = vmov 0.0  }
  0xa3   : > { %1059 = vmatmul.mubr.f32.gmra.mrb[4].mxu1 %v186_v41  ;;  %550 = vmatprep.mubr.f32.mxu0 %v190_v44  ;;  %v464_v41 = vld [vmem:[#allocation5 + $0x5e0] sm:$0xff]  ;;  %v271_v28 = vld [vmem:[%s2673_s3 + $0x2d8] sm:$0xff]  ;;  %v274_v30 = vld [vmem:[%s2673_s3 + $0x2f0] sm:$0xff] }
  0xa4   : > { %1064 = vmatprep.mubr.f32.mxu1 %v190_v44  ;;  %2071 = vmatpush1.bf16.msra.mxu0 %v2070_v45  ;;  %v466_v44 = vld [vmem:[#allocation5 + $0x5f0] sm:$0xff]  ;;  %v201_v45 = vld [vmem:[%s2673_s3 + $0xa8] sm:$0xff]  ;;  %v188_v35 = vld [vmem:[%s2673_s3 + $0x40] sm:$0xff] }
  0xa5   : > { %2167 = vmatpush1.bf16.msra.mxu1 %v2166_v46  ;;  %2073 = vmatprep.subr.bf16.mxu0 %v2072_v47  ;;  %v205_v46 = vld [vmem:[%s2673_s3 + $0xc8] sm:$0xff]  ;;  %v2090_v47 = vpack.c.bf16 %v464_v41, %v460_v40  ;;  %v2186_v48 = vpack.c.bf16 %v466_v44, %v462_v43  ;;  %v203_v40 = vld [vmem:[%s2673_s3 + $0xb8] sm:$0xff]  ;;  %v206_v41 = vld [vmem:[%s2673_s3 + $0xd0] sm:$0xff] }
  0xa6   : > { %551 = vmatmul.mubr.f32.gmra.mrb[6].mxu0 %v189_v55  ;;  %2169 = vmatprep.subr.bf16.mxu1 %v2168_v51  ;;  %v207_v51 = vld [vmem:[%s2673_s3 + $0xd8] sm:$0xff]  ;;  %v273_v31 = vld [vmem:[%s2673_s3 + $0x2e8] sm:$0xff]  ;;  %v212_v43 = vld [vmem:[%s2673_s3 + $0x100] sm:$0xff] }
  0xa7   : > { %1065 = vmatmul.mubr.f32.gmra.mrb[6].mxu1 %v189_v55  ;;  %556 = vmatprep.mubr.f32.mxu0 %v193_v58  ;;  %v213_v55 = vld [vmem:[%s2673_s3 + $0x108] sm:$0xff]  ;;  %v215_v44 = vld [vmem:[%s2673_s3 + $0x118] sm:$0xff] }
  0xa8   : > { %1070 = vmatprep.mubr.f32.mxu1 %v193_v58  ;;  %2075 = vmatpush1.bf16.msra.mxu0 %v2074_v59  ;;  %v220_v58 = vld [vmem:[%s2673_s3 + $0x140] sm:$0xff]  ;;  %v219_v59 = vld [vmem:[%s2673_s3 + $0x138] sm:$0xff]  ;;  %v185_v34 = vld [vmem:[%s2673_s3 + $0x28] sm:$0xff] }
  0xa9   : > { %2171 = vmatpush1.bf16.msra.mxu1 %v2170_v60  ;;  %2077 = vmatprep.subr.bf16.mxu0 %v2076_v61  ;;  %v223_v60 = vld [vmem:[%s2673_s3 + $0x158] sm:$0xff]  ;;  %v222_v61 = vld [vmem:[%s2673_s3 + $0x150] sm:$0xff] }
  0xaa   : > { %557 = vmatmul.mubr.f32.gmra.mrb[8].mxu0 %v192_v5  ;;  %2173 = vmatprep.subr.bf16.mxu1 %v2172_v1  ;;  %v228_v1 = vld [vmem:[%s2673_s3 + $0x180] sm:$0xff] }
  0xab   : > { %1071 = vmatmul.mubr.f32.gmra.mrb[8].mxu1 %v192_v5  ;;  %562 = vmatprep.mubr.f32.mxu0 %v196_v8  ;;  %v234_v5 = vld [vmem:[%s2673_s3 + $0x1b0] sm:$0xff] }
  0xac   : > { %1076 = vmatprep.mubr.f32.mxu1 %v196_v8  ;;  %2079 = vmatpush1.bf16.msra.mxu0 %v2078_v9  ;;  %v241_v8 = vld [vmem:[%s2673_s3 + $0x1e8] sm:$0xff]  ;;  %v240_v9 = vld [vmem:[%s2673_s3 + $0x1e0] sm:$0xff] }
  0xad   : > { %2175 = vmatpush1.bf16.msra.mxu1 %v2174_v10  ;;  %2081 = vmatprep.subr.bf16.mxu0 %v2080_v11  ;;  %v244_v10 = vld [vmem:[%s2673_s3 + $0x200] sm:$0xff]  ;;  %v243_v11 = vld [vmem:[%s2673_s3 + $0x1f8] sm:$0xff] }
  0xae   : > { %563 = vmatmul.mubr.f32.gmra.mrb[10].mxu0 %v195_v19  ;;  %2177 = vmatprep.subr.bf16.mxu1 %v2176_v15  ;;  %v249_v15 = vld [vmem:[%s2673_s3 + $0x228] sm:$0xff] }
  0xaf   : > { %1077 = vmatmul.mubr.f32.gmra.mrb[10].mxu1 %v195_v19  ;;  %568 = vmatprep.mubr.f32.mxu0 %v199_v22  ;;  %v255_v19 = vld [vmem:[%s2673_s3 + $0x258] sm:$0xff] }
  0xb0   : > { %1082 = vmatprep.mubr.f32.mxu1 %v199_v22  ;;  %2083 = vmatpush1.bf16.msra.mxu0 %v2082_v23  ;;  %v262_v22 = vld [vmem:[%s2673_s3 + $0x290] sm:$0xff]  ;;  %v261_v23 = vld [vmem:[%s2673_s3 + $0x288] sm:$0xff] }
  0xb1   : > { %2179 = vmatpush1.bf16.msra.mxu1 %v2178_v24  ;;  %2085 = vmatprep.subr.bf16.mxu0 %v2084_v25  ;;  %v265_v24 = vld [vmem:[%s2673_s3 + $0x2a8] sm:$0xff]  ;;  %v264_v25 = vld [vmem:[%s2673_s3 + $0x2a0] sm:$0xff] }
  0xb2   : > { %569 = vmatmul.mubr.f32.gmra.mrb[12].mxu0 %v198_v33  ;;  %2181 = vmatprep.subr.bf16.mxu1 %v2180_v29  ;;  %v270_v29 = vld [vmem:[%s2673_s3 + $0x2d0] sm:$0xff] }
  0xb3   : > { %1083 = vmatmul.mubr.f32.gmra.mrb[12].mxu1 %v198_v33  ;;  %574 = vmatprep.mubr.f32.mxu0 %v202_v36  ;;  %v182_v33 = vld [vmem:[%s2673_s3 + $0x10] sm:$0xff] }
  0xb4   : > { %1088 = vmatprep.mubr.f32.mxu1 %v202_v36  ;;  %2087 = vmatpush1.bf16.msra.mxu0 %v2086_v37  ;;  %v191_v36 = vld [vmem:[%s2673_s3 + $0x58] sm:$0xff]  ;;  %v194_v37 = vld [vmem:[%s2673_s3 + $0x70] sm:$0xff] }
  0xb5   : > { %2183 = vmatpush1.bf16.msra.mxu1 %v2182_v38  ;;  %2089 = vmatprep.subr.bf16.mxu0 %v2088_v39  ;;  %v197_v38 = vld [vmem:[%s2673_s3 + $0x88] sm:$0xff]  ;;  %v200_v39 = vld [vmem:[%s2673_s3 + $0xa0] sm:$0xff] }
  0xb6   : > { %575 = vmatmul.mubr.f32.gmra.mrb[14].mxu0 %v201_v45  ;;  %2185 = vmatprep.subr.bf16.mxu1 %v2184_v42  ;;  %v209_v42 = vld [vmem:[%s2673_s3 + $0xe8] sm:$0xff] }
  0xb7   : > { %1089 = vmatmul.mubr.f32.gmra.mrb[14].mxu1 %v201_v45  ;;  %580 = vmatprep.mubr.f32.mxu0 %v205_v46  ;;  %v218_v45 = vld [vmem:[%s2673_s3 + $0x130] sm:$0xff] }
  0xb8   : > { %1094 = vmatprep.mubr.f32.mxu1 %v205_v46  ;;  %2091 = vmatpush1.bf16.msra.mxu0 %v2090_v47  ;;  %v221_v46 = vld [vmem:[%s2673_s3 + $0x148] sm:$0xff]  ;;  %v224_v47 = vld [vmem:[%s2673_s3 + $0x160] sm:$0xff] }
  0xb9   : > { %2187 = vmatpush1.bf16.msra.mxu1 %v2186_v48  ;;  %v227_v48 = vld [vmem:[%s2673_s3 + $0x178] sm:$0xff] }
  0xba   : > { %581 = vmatmul.mubr.f32.gmra.mrb[16].mxu0 %v204_v49 }
  0xbb   : > { %1095 = vmatmul.mubr.f32.gmra.mrb[16].mxu1 %v204_v49  ;;  %586 = vmatprep.mubr.f32.mxu0 %v208_v50  ;;  %v230_v49 = vld [vmem:[%s2673_s3 + $0x190] sm:$0xff] }
  0xbc   : > { %1100 = vmatprep.mubr.f32.mxu1 %v208_v50  ;;  %v233_v50 = vld [vmem:[%s2673_s3 + $0x1a8] sm:$0xff] }
  0xbe   : > { %587 = vmatmul.mubr.f32.gmra.mrb[18].mxu0 %v207_v51 }
  0xbf   : > { %1101 = vmatmul.mubr.f32.gmra.mrb[18].mxu1 %v207_v51  ;;  %592 = vmatprep.mubr.f32.mxu0 %v211_v52  ;;  %v236_v51 = vld [vmem:[%s2673_s3 + $0x1c0] sm:$0xff] }
  0xc0   : > { %1106 = vmatprep.mubr.f32.mxu1 %v211_v52  ;;  %v239_v52 = vld [vmem:[%s2673_s3 + $0x1d8] sm:$0xff] }
  0xc2   : > { %593 = vmatmul.mubr.f32.gmra.mrb[20].mxu0 %v210_v53 }
  0xc3   : > { %1107 = vmatmul.mubr.f32.gmra.mrb[20].mxu1 %v210_v53  ;;  %598 = vmatprep.mubr.f32.mxu0 %v214_v54  ;;  %v242_v53 = vld [vmem:[%s2673_s3 + $0x1f0] sm:$0xff] }
  0xc4   : > { %1112 = vmatprep.mubr.f32.mxu1 %v214_v54  ;;  %v245_v54 = vld [vmem:[%s2673_s3 + $0x208] sm:$0xff] }
  0xc6   : > { %599 = vmatmul.mubr.f32.gmra.mrb[22].mxu0 %v213_v55 }
  0xc7   : > { %1113 = vmatmul.mubr.f32.gmra.mrb[22].mxu1 %v213_v55  ;;  %604 = vmatprep.mubr.f32.mxu0 %v217_v56  ;;  %v248_v55 = vld [vmem:[%s2673_s3 + $0x220] sm:$0xff] }
  0xc8   : > { %1118 = vmatprep.mubr.f32.mxu1 %v217_v56  ;;  %v251_v56 = vld [vmem:[%s2673_s3 + $0x238] sm:$0xff] }
  0xca   : > { %605 = vmatmul.mubr.f32.gmra.mrb[24].mxu0 %v216_v57 }
  0xcb   : > { %1119 = vmatmul.mubr.f32.gmra.mrb[24].mxu1 %v216_v57  ;;  %610 = vmatprep.mubr.f32.mxu0 %v220_v58  ;;  %v254_v57 = vld [vmem:[%s2673_s3 + $0x250] sm:$0xff] }
  0xcc   : > { %1124 = vmatprep.mubr.f32.mxu1 %v220_v58  ;;  %v257_v58 = vld [vmem:[%s2673_s3 + $0x268] sm:$0xff] }
  0xce   : > { %611 = vmatmul.mubr.f32.gmra.mrb[26].mxu0 %v219_v59 }
  0xcf   : > { %1125 = vmatmul.mubr.f32.gmra.mrb[26].mxu1 %v219_v59  ;;  %616 = vmatprep.mubr.f32.mxu0 %v223_v60  ;;  %v260_v59 = vld [vmem:[%s2673_s3 + $0x280] sm:$0xff] }
  0xd0   : > { %1130 = vmatprep.mubr.f32.mxu1 %v223_v60  ;;  %v263_v60 = vld [vmem:[%s2673_s3 + $0x298] sm:$0xff] }
  0xd2   : > { %617 = vmatmul.mubr.f32.gmra.mrb[28].mxu0 %v222_v61 }
  0xd3   : > { %1131 = vmatmul.mubr.f32.gmra.mrb[28].mxu1 %v222_v61  ;;  %622 = vmatprep.mubr.f32.mxu0 %v226_v62  ;;  %v266_v61 = vld [vmem:[%s2673_s3 + $0x2b0] sm:$0xff] }
  0xd4   : > { %1136 = vmatprep.mubr.f32.mxu1 %v226_v62  ;;  %v269_v62 = vld [vmem:[%s2673_s3 + $0x2c8] sm:$0xff] }
  0xd6   : > { %623 = vmatmul.mubr.f32.gmra.mrb[30].mxu0 %v225_v63 }
  0xd7   : > { %1137 = vmatmul.mubr.f32.gmra.mrb[30].mxu1 %v225_v63  ;;  %628 = vmatprep.mubr.f32.mxu0 %v229_v0  ;;  %v272_v63 = vld [vmem:[%s2673_s3 + $0x2e0] sm:$0xff] }
  0xd8   : > { %1142 = vmatprep.mubr.f32.mxu1 %v229_v0  ;;  %v275_v0 = vld [vmem:[%s2673_s3 + $0x2f8] sm:$0xff] }
  0xda   : > { %629 = vmatmul.mubr.f32.gmra.mrb[32].mxu0 %v228_v1 }
  0xdb   : > { %1143 = vmatmul.mubr.f32.gmra.mrb[32].mxu1 %v228_v1  ;;  %634 = vmatprep.mubr.f32.mxu0 %v232_v2 }
  0xdc   : > { %1148 = vmatprep.mubr.f32.mxu1 %v232_v2 }
  0xde   : > { %635 = vmatmul.mubr.f32.gmra.mrb[34].mxu0 %v231_v3 }
  0xdf   : > { %1149 = vmatmul.mubr.f32.gmra.mrb[34].mxu1 %v231_v3  ;;  %640 = vmatprep.mubr.f32.mxu0 %v235_v4 }
  0xe0   : > { %1154 = vmatprep.mubr.f32.mxu1 %v235_v4 }
  0xe2   : > { %641 = vmatmul.mubr.f32.gmra.mrb[36].mxu0 %v234_v5 }
  0xe3   : > { %1155 = vmatmul.mubr.f32.gmra.mrb[36].mxu1 %v234_v5  ;;  %646 = vmatprep.mubr.f32.mxu0 %v238_v6 }
  0xe4   : > { %1160 = vmatprep.mubr.f32.mxu1 %v238_v6 }
  0xe6   : > { %647 = vmatmul.mubr.f32.gmra.mrb[38].mxu0 %v237_v7 }
  0xe7   : > { %1161 = vmatmul.mubr.f32.gmra.mrb[38].mxu1 %v237_v7  ;;  %652 = vmatprep.mubr.f32.mxu0 %v241_v8 }
  0xe8   : > { %1166 = vmatprep.mubr.f32.mxu1 %v241_v8 }
  0xea   : > { %653 = vmatmul.mubr.f32.gmra.mrb[40].mxu0 %v240_v9 }
  0xeb   : > { %1167 = vmatmul.mubr.f32.gmra.mrb[40].mxu1 %v240_v9  ;;  %658 = vmatprep.mubr.f32.mxu0 %v244_v10 }
  0xec   : > { %1172 = vmatprep.mubr.f32.mxu1 %v244_v10 }
  0xee   : > { %659 = vmatmul.mubr.f32.gmra.mrb[42].mxu0 %v243_v11 }
  0xef   : > { %1173 = vmatmul.mubr.f32.gmra.mrb[42].mxu1 %v243_v11  ;;  %664 = vmatprep.mubr.f32.mxu0 %v247_v12 }
  0xf0   : > { %1178 = vmatprep.mubr.f32.mxu1 %v247_v12 }
  0xf2   : > { %665 = vmatmul.mubr.f32.gmra.mrb[44].mxu0 %v246_v13 }
  0xf3   : > { %1179 = vmatmul.mubr.f32.gmra.mrb[44].mxu1 %v246_v13  ;;  %670 = vmatprep.mubr.f32.mxu0 %v250_v14 }
  0xf4   : > { %1184 = vmatprep.mubr.f32.mxu1 %v250_v14 }
  0xf6   : > { %671 = vmatmul.mubr.f32.gmra.mrb[46].mxu0 %v249_v15 }
  0xf7   : > { %1185 = vmatmul.mubr.f32.gmra.mrb[46].mxu1 %v249_v15  ;;  %676 = vmatprep.mubr.f32.mxu0 %v253_v16 }
  0xf8   : > { %1190 = vmatprep.mubr.f32.mxu1 %v253_v16 }
  0xfa   : > { %677 = vmatmul.mubr.f32.gmra.mrb[48].mxu0 %v252_v17 }
  0xfb   : > { %1191 = vmatmul.mubr.f32.gmra.mrb[48].mxu1 %v252_v17  ;;  %682 = vmatprep.mubr.f32.mxu0 %v256_v18 }
  0xfc   : > { %1196 = vmatprep.mubr.f32.mxu1 %v256_v18 }
  0xfe   : > { %683 = vmatmul.mubr.f32.gmra.mrb[50].mxu0 %v255_v19 }
  0xff   : > { %1197 = vmatmul.mubr.f32.gmra.mrb[50].mxu1 %v255_v19  ;;  %688 = vmatprep.mubr.f32.mxu0 %v259_v20 }
 0x100   : > { %1202 = vmatprep.mubr.f32.mxu1 %v259_v20 }
 0x102   : > { %689 = vmatmul.mubr.f32.gmra.mrb[52].mxu0 %v258_v21 }
 0x103   : > { %1203 = vmatmul.mubr.f32.gmra.mrb[52].mxu1 %v258_v21  ;;  %694 = vmatprep.mubr.f32.mxu0 %v262_v22 }
 0x104   : > { %1208 = vmatprep.mubr.f32.mxu1 %v262_v22 }
 0x106   : > { %695 = vmatmul.mubr.f32.gmra.mrb[54].mxu0 %v261_v23 }
 0x107   : > { %1209 = vmatmul.mubr.f32.gmra.mrb[54].mxu1 %v261_v23  ;;  %700 = vmatprep.mubr.f32.mxu0 %v265_v24 }
 0x108   : > { %1214 = vmatprep.mubr.f32.mxu1 %v265_v24 }
 0x10a   : > { %701 = vmatmul.mubr.f32.gmra.mrb[56].mxu0 %v264_v25 }
 0x10b   : > { %1215 = vmatmul.mubr.f32.gmra.mrb[56].mxu1 %v264_v25  ;;  %706 = vmatprep.mubr.f32.mxu0 %v268_v26 }
 0x10c   : > { %1220 = vmatprep.mubr.f32.mxu1 %v268_v26 }
 0x10e   : > { %707 = vmatmul.mubr.f32.gmra.mrb[58].mxu0 %v267_v27 }
 0x10f   : > { %1221 = vmatmul.mubr.f32.gmra.mrb[58].mxu1 %v267_v27  ;;  %712 = vmatprep.mubr.f32.mxu0 %v271_v28 }
 0x110   : > { %1226 = vmatprep.mubr.f32.mxu1 %v271_v28 }
 0x112   : > { %713 = vmatmul.mubr.f32.gmra.mrb[60].mxu0 %v270_v29 }
 0x113   : > { %1227 = vmatmul.mubr.f32.gmra.mrb[60].mxu1 %v270_v29  ;;  %718 = vmatprep.mubr.f32.mxu0 %v274_v30 }
 0x114   : > { %1232 = vmatprep.mubr.f32.mxu1 %v274_v30 }
 0x116   : > { %719 = vmatmul.mubr.f32.gmra.mrb[62].mxu0 %v273_v31 }
 0x117   : > { %1233 = vmatmul.mubr.f32.gmra.mrb[62].mxu1 %v273_v31  ;;  %789 = vmatprep.mubr.f32.mxu0 %v2519_v32 }
 0x118   : > { %1303 = vmatprep.mubr.f32.mxu1 %v2519_v32 }
 0x11a   : > { %790 = vmatmul.mubr.f32.vlgmr.msra.gmra.mrb[0].mxu0 %v182_v33 }
 0x11b   : > { %1304 = vmatmul.mubr.f32.vlgmr.msra.gmra.mrb[0].mxu1 %v182_v33  ;;  %795 = vmatprep.mubr.f32.mxu0 %v2519_v32 }
 0x11c   : > { %1309 = vmatprep.mubr.f32.mxu1 %v2519_v32 }
 0x11e   : > { %796 = vmatmul.mubr.f32.gmra.mrb[2].mxu0 %v185_v34 }
 0x11f   : > { %1310 = vmatmul.mubr.f32.gmra.mrb[2].mxu1 %v185_v34  ;;  %801 = vmatprep.mubr.f32.mxu0 %v2519_v32 }
 0x120   : > { %1315 = vmatprep.mubr.f32.mxu1 %v2519_v32 }
 0x122   : > { %802 = vmatmul.mubr.f32.gmra.mrb[4].mxu0 %v188_v35 }
 0x123   : > { %1316 = vmatmul.mubr.f32.gmra.mrb[4].mxu1 %v188_v35  ;;  %807 = vmatprep.mubr.f32.mxu0 %v2519_v32 }
 0x124   : > { %1321 = vmatprep.mubr.f32.mxu1 %v2519_v32 }
 0x126   : > { %808 = vmatmul.mubr.f32.gmra.mrb[6].mxu0 %v191_v36 }
 0x127   : > { %1322 = vmatmul.mubr.f32.gmra.mrb[6].mxu1 %v191_v36  ;;  %813 = vmatprep.mubr.f32.mxu0 %v2519_v32 }
 0x128   : > { %1327 = vmatprep.mubr.f32.mxu1 %v2519_v32 }
 0x12a   : > { %814 = vmatmul.mubr.f32.gmra.mrb[8].mxu0 %v194_v37 }
 0x12b   : > { %1328 = vmatmul.mubr.f32.gmra.mrb[8].mxu1 %v194_v37  ;;  %819 = vmatprep.mubr.f32.mxu0 %v2519_v32 }
 0x12c   : > { %1333 = vmatprep.mubr.f32.mxu1 %v2519_v32 }
 0x12e   : > { %820 = vmatmul.mubr.f32.gmra.mrb[10].mxu0 %v197_v38 }
 0x12f   : > { %1334 = vmatmul.mubr.f32.gmra.mrb[10].mxu1 %v197_v38  ;;  %825 = vmatprep.mubr.f32.mxu0 %v2519_v32 }
 0x130   : > { %1339 = vmatprep.mubr.f32.mxu1 %v2519_v32 }
 0x132   : > { %826 = vmatmul.mubr.f32.gmra.mrb[12].mxu0 %v200_v39 }
 0x133   : > { %1340 = vmatmul.mubr.f32.gmra.mrb[12].mxu1 %v200_v39  ;;  %831 = vmatprep.mubr.f32.mxu0 %v2519_v32 }
 0x134   : > { %1345 = vmatprep.mubr.f32.mxu1 %v2519_v32 }
 0x136   : > { %832 = vmatmul.mubr.f32.gmra.mrb[14].mxu0 %v203_v40 }
 0x137   : > { %1346 = vmatmul.mubr.f32.gmra.mrb[14].mxu1 %v203_v40  ;;  %837 = vmatprep.mubr.f32.mxu0 %v2519_v32 }
 0x138   : > { %1351 = vmatprep.mubr.f32.mxu1 %v2519_v32 }
 0x13a   : > { %838 = vmatmul.mubr.f32.gmra.mrb[16].mxu0 %v206_v41 }
 0x13b   : > { %1352 = vmatmul.mubr.f32.gmra.mrb[16].mxu1 %v206_v41  ;;  %843 = vmatprep.mubr.f32.mxu0 %v2519_v32 }
 0x13c   : > { %1357 = vmatprep.mubr.f32.mxu1 %v2519_v32 }
 0x13e   : > { %844 = vmatmul.mubr.f32.gmra.mrb[18].mxu0 %v209_v42 }
 0x13f   : > { %1358 = vmatmul.mubr.f32.gmra.mrb[18].mxu1 %v209_v42  ;;  %849 = vmatprep.mubr.f32.mxu0 %v2519_v32 }
 0x140   : > { %1363 = vmatprep.mubr.f32.mxu1 %v2519_v32 }
 0x142   : > { %850 = vmatmul.mubr.f32.gmra.mrb[20].mxu0 %v212_v43 }
 0x143   : > { %1364 = vmatmul.mubr.f32.gmra.mrb[20].mxu1 %v212_v43  ;;  %855 = vmatprep.mubr.f32.mxu0 %v2519_v32 }
 0x144   : > { %1369 = vmatprep.mubr.f32.mxu1 %v2519_v32 }
 0x146   : > { %856 = vmatmul.mubr.f32.gmra.mrb[22].mxu0 %v215_v44 }
 0x147   : > { %1370 = vmatmul.mubr.f32.gmra.mrb[22].mxu1 %v215_v44  ;;  %861 = vmatprep.mubr.f32.mxu0 %v2519_v32 }
 0x148   : > { %1375 = vmatprep.mubr.f32.mxu1 %v2519_v32 }
 0x14a   : > { %862 = vmatmul.mubr.f32.gmra.mrb[24].mxu0 %v218_v45 }
 0x14b   : > { %1376 = vmatmul.mubr.f32.gmra.mrb[24].mxu1 %v218_v45  ;;  %867 = vmatprep.mubr.f32.mxu0 %v2519_v32 }
 0x14c   : > { %1381 = vmatprep.mubr.f32.mxu1 %v2519_v32 }
 0x14e   : > { %868 = vmatmul.mubr.f32.gmra.mrb[26].mxu0 %v221_v46 }
 0x14f   : > { %1382 = vmatmul.mubr.f32.gmra.mrb[26].mxu1 %v221_v46  ;;  %873 = vmatprep.mubr.f32.mxu0 %v2519_v32 }
 0x150   : > { %1387 = vmatprep.mubr.f32.mxu1 %v2519_v32 }
 0x152   : > { %874 = vmatmul.mubr.f32.gmra.mrb[28].mxu0 %v224_v47 }
 0x153   : > { %1388 = vmatmul.mubr.f32.gmra.mrb[28].mxu1 %v224_v47  ;;  %879 = vmatprep.mubr.f32.mxu0 %v2519_v32 }
 0x154   : > { %1393 = vmatprep.mubr.f32.mxu1 %v2519_v32 }
 0x156   : > { %880 = vmatmul.mubr.f32.gmra.mrb[30].mxu0 %v227_v48 }
 0x157   : > { %1394 = vmatmul.mubr.f32.gmra.mrb[30].mxu1 %v227_v48  ;;  %885 = vmatprep.mubr.f32.mxu0 %v2519_v32 }
 0x158   : > { %1399 = vmatprep.mubr.f32.mxu1 %v2519_v32 }
 0x15a   : > { %886 = vmatmul.mubr.f32.gmra.mrb[32].mxu0 %v230_v49 }
 0x15b   : > { %1400 = vmatmul.mubr.f32.gmra.mrb[32].mxu1 %v230_v49  ;;  %891 = vmatprep.mubr.f32.mxu0 %v2519_v32 }
 0x15c   : > { %1405 = vmatprep.mubr.f32.mxu1 %v2519_v32 }
 0x15e   : > { %892 = vmatmul.mubr.f32.gmra.mrb[34].mxu0 %v233_v50 }
 0x15f   : > { %1406 = vmatmul.mubr.f32.gmra.mrb[34].mxu1 %v233_v50  ;;  %897 = vmatprep.mubr.f32.mxu0 %v2519_v32 }
 0x160   : > { %1411 = vmatprep.mubr.f32.mxu1 %v2519_v32 }
 0x162   : > { %898 = vmatmul.mubr.f32.gmra.mrb[36].mxu0 %v236_v51 }
 0x163   : > { %1412 = vmatmul.mubr.f32.gmra.mrb[36].mxu1 %v236_v51  ;;  %903 = vmatprep.mubr.f32.mxu0 %v2519_v32 }
 0x164   : > { %1417 = vmatprep.mubr.f32.mxu1 %v2519_v32 }
 0x166   : > { %904 = vmatmul.mubr.f32.gmra.mrb[38].mxu0 %v239_v52 }
 0x167   : > { %1418 = vmatmul.mubr.f32.gmra.mrb[38].mxu1 %v239_v52  ;;  %909 = vmatprep.mubr.f32.mxu0 %v2519_v32 }
 0x168   : > { %1423 = vmatprep.mubr.f32.mxu1 %v2519_v32 }
 0x16a   : > { %910 = vmatmul.mubr.f32.gmra.mrb[40].mxu0 %v242_v53 }
 0x16b   : > { %1424 = vmatmul.mubr.f32.gmra.mrb[40].mxu1 %v242_v53  ;;  %915 = vmatprep.mubr.f32.mxu0 %v2519_v32 }
 0x16c   : > { %1429 = vmatprep.mubr.f32.mxu1 %v2519_v32 }
 0x16e   : > { %916 = vmatmul.mubr.f32.gmra.mrb[42].mxu0 %v245_v54 }
 0x16f   : > { %1430 = vmatmul.mubr.f32.gmra.mrb[42].mxu1 %v245_v54  ;;  %921 = vmatprep.mubr.f32.mxu0 %v2519_v32 }
 0x170   : > { %1435 = vmatprep.mubr.f32.mxu1 %v2519_v32 }
 0x172   : > { %922 = vmatmul.mubr.f32.gmra.mrb[44].mxu0 %v248_v55 }
 0x173   : > { %1436 = vmatmul.mubr.f32.gmra.mrb[44].mxu1 %v248_v55  ;;  %927 = vmatprep.mubr.f32.mxu0 %v2519_v32 }
 0x174   : > { %1441 = vmatprep.mubr.f32.mxu1 %v2519_v32 }
 0x176   : > { %928 = vmatmul.mubr.f32.gmra.mrb[46].mxu0 %v251_v56 }
 0x177   : > { %1442 = vmatmul.mubr.f32.gmra.mrb[46].mxu1 %v251_v56  ;;  %933 = vmatprep.mubr.f32.mxu0 %v2519_v32 }
 0x178   : > { %1447 = vmatprep.mubr.f32.mxu1 %v2519_v32 }
 0x17a   : > { %934 = vmatmul.mubr.f32.gmra.mrb[48].mxu0 %v254_v57 }
 0x17b   : > { %1448 = vmatmul.mubr.f32.gmra.mrb[48].mxu1 %v254_v57  ;;  %939 = vmatprep.mubr.f32.mxu0 %v2519_v32 }
 0x17c   : > { %1453 = vmatprep.mubr.f32.mxu1 %v2519_v32 }
 0x17e   : > { %940 = vmatmul.mubr.f32.gmra.mrb[50].mxu0 %v257_v58 }
 0x17f   : > { %1454 = vmatmul.mubr.f32.gmra.mrb[50].mxu1 %v257_v58  ;;  %945 = vmatprep.mubr.f32.mxu0 %v2519_v32 }
 0x180   : > { %1459 = vmatprep.mubr.f32.mxu1 %v2519_v32 }
 0x182   : > { %946 = vmatmul.mubr.f32.gmra.mrb[52].mxu0 %v260_v59 }
 0x183   : > { %1460 = vmatmul.mubr.f32.gmra.mrb[52].mxu1 %v260_v59  ;;  %951 = vmatprep.mubr.f32.mxu0 %v2519_v32 }
 0x184   : > { %1465 = vmatprep.mubr.f32.mxu1 %v2519_v32 }
 0x186   : > { %952 = vmatmul.mubr.f32.gmra.mrb[54].mxu0 %v263_v60 }
 0x187   : > { %1466 = vmatmul.mubr.f32.gmra.mrb[54].mxu1 %v263_v60  ;;  %957 = vmatprep.mubr.f32.mxu0 %v2519_v32 }
 0x188   : > { %1471 = vmatprep.mubr.f32.mxu1 %v2519_v32 }
 0x18a   : > { %958 = vmatmul.mubr.f32.gmra.mrb[56].mxu0 %v266_v61 }
 0x18b   : > { %1472 = vmatmul.mubr.f32.gmra.mrb[56].mxu1 %v266_v61  ;;  %963 = vmatprep.mubr.f32.mxu0 %v2519_v32 }
 0x18c   : > { %1477 = vmatprep.mubr.f32.mxu1 %v2519_v32 }
 0x18e   : > { %964 = vmatmul.mubr.f32.gmra.mrb[58].mxu0 %v269_v62 }
 0x18f   : > { %1478 = vmatmul.mubr.f32.gmra.mrb[58].mxu1 %v269_v62  ;;  %969 = vmatprep.mubr.f32.mxu0 %v2519_v32 }
 0x190   : > { %1483 = vmatprep.mubr.f32.mxu1 %v2519_v32 }
 0x192   : > { %970 = vmatmul.mubr.f32.gmra.mrb[60].mxu0 %v272_v63 }
 0x193   : > { %1484 = vmatmul.mubr.f32.gmra.mrb[60].mxu1 %v272_v63  ;;  %975 = vmatprep.mubr.f32.mxu0 %v2519_v32 }
 0x194   : > { %1489 = vmatprep.mubr.f32.mxu1 %v2519_v32 }
 0x196   : > { %976 = vmatmul.mubr.f32.gmra.mrb[62].mxu0 %v275_v0 }
 0x197   : > { %1490 = vmatmul.mubr.f32.gmra.mrb[62].mxu1 %v275_v0 }
 0x1ed   : > { %v791_v1 = vpop.f32.mrb[0].mxu0 }
 0x1ee   : > { %v1496_v2 = vmax.f32 %v791_v1, 159620.0  ;;  %v1305_v3 = vpop.f32.mrb[0].mxu1  ;;  %v793_v4 = vpop.f32.mrb[1].mxu0 }
 0x1ef   : > { %v1498_v5 = vmax.f32 %v1305_v3, 159620.0  ;;  %v1497_v6 = vmax.f32 %v793_v4, 159620.0  ;;  %v1307_v7 = vpop.f32.mrb[1].mxu1 }
 0x1f0   : > { %v1624_v8 = vmin.f32 %v1496_v2, 546218.0  ;;  %v1499_v9 = vmax.f32 %v1307_v7, 159620.0 }
 0x1f1   : > { %v1626_v10 = vmin.f32 %v1498_v5, 546218.0  ;;  %v1625_v11 = vmin.f32 %v1497_v6, 546218.0  ;;  %v797_v12 = vpop.f32.mrb[2].mxu0 }
 0x1f2   : > { %1752 = vst [vmem:[%s2844_s17] sm:$0xff] %v1624_v8  ;;  %v1627_v13 = vmin.f32 %v1499_v9, 546218.0  ;;  %v1500_v14 = vmax.f32 %v797_v12, 159620.0  ;;  %v1311_v15 = vpop.f32.mrb[2].mxu1  ;;  %v799_v16 = vpop.f32.mrb[3].mxu0 }
 0x1f3   : > { %1754 = vst [vmem:[%s2844_s17 + $0x10] sm:$0xff] %v1626_v10  ;;  %1753 = vst [vmem:[%s2844_s17 + $0x8] sm:$0xff] %v1625_v11  ;;  %v1502_v17 = vmax.f32 %v1311_v15, 159620.0  ;;  %v1501_v18 = vmax.f32 %v799_v16, 159620.0 }
 0x1f4   : > { %v1313_v19 = vpop.f32.mrb[3].mxu1  ;;  %1755 = vst [vmem:[%s2844_s17 + $0x18] sm:$0xff] %v1627_v13  ;;  %v1628_v20 = vmin.f32 %v1500_v14, 546218.0 }
 0x1f5   : > { %v1503_v21 = vmax.f32 %v1313_v19, 159620.0  ;;  %v1630_v22 = vmin.f32 %v1502_v17, 546218.0  ;;  %v1629_v23 = vmin.f32 %v1501_v18, 546218.0 }
 0x1f6   : > { %v803_v24 = vpop.f32.mrb[4].mxu0  ;;  %1756 = vst [vmem:[%s2844_s17 + $0x20] sm:$0xff] %v1628_v20  ;;  %v1317_v27 = vpop.f32.mrb[4].mxu1 }
 0x1f7   : > { %v1631_v25 = vmin.f32 %v1503_v21, 546218.0  ;;  %v1504_v26 = vmax.f32 %v803_v24, 159620.0  ;;  %v805_v28 = vpop.f32.mrb[5].mxu0  ;;  %1758 = vst [vmem:[%s2844_s17 + $0x30] sm:$0xff] %v1630_v22 }
 0x1f8   : > { %1757 = vst [vmem:[%s2844_s17 + $0x28] sm:$0xff] %v1629_v23  ;;  %v1506_v29 = vmax.f32 %v1317_v27, 159620.0  ;;  %v1505_v30 = vmax.f32 %v805_v28, 159620.0  ;;  %v1319_v31 = vpop.f32.mrb[5].mxu1 }
 0x1f9   : > { %1759 = vst [vmem:[%s2844_s17 + $0x38] sm:$0xff] %v1631_v25  ;;  %v1632_v32 = vmin.f32 %v1504_v26, 546218.0  ;;  %v1507_v33 = vmax.f32 %v1319_v31, 159620.0  ;;  %v809_v36 = vpop.f32.mrb[6].mxu0 }
 0x1fa   : > { %v1634_v34 = vmin.f32 %v1506_v29, 546218.0  ;;  %v1633_v35 = vmin.f32 %v1505_v30, 546218.0  ;;  %v1508_v38 = vmax.f32 %v809_v36, 159620.0 }
 0x1fb   : > { %1760 = vst [vmem:[%s2844_s17 + $0x40] sm:$0xff] %v1632_v32  ;;  %v1635_v37 = vmin.f32 %v1507_v33, 546218.0  ;;  %v1323_v39 = vpop.f32.mrb[6].mxu1  ;;  %v811_v40 = vpop.f32.mrb[7].mxu0 }
 0x1fc   : > { %1762 = vst [vmem:[%s2844_s17 + $0x50] sm:$0xff] %v1634_v34  ;;  %1761 = vst [vmem:[%s2844_s17 + $0x48] sm:$0xff] %v1633_v35  ;;  %v1510_v41 = vmax.f32 %v1323_v39, 159620.0  ;;  %v1509_v42 = vmax.f32 %v811_v40, 159620.0 }
 0x1fd   : > { %v1325_v43 = vpop.f32.mrb[7].mxu1  ;;  %1763 = vst [vmem:[%s2844_s17 + $0x58] sm:$0xff] %v1635_v37  ;;  %v1636_v44 = vmin.f32 %v1508_v38, 546218.0  ;;  %v815_v48 = vpop.f32.mrb[8].mxu0 }
 0x1fe   : > { %v1511_v45 = vmax.f32 %v1325_v43, 159620.0  ;;  %v1638_v46 = vmin.f32 %v1510_v41, 546218.0  ;;  %v1637_v47 = vmin.f32 %v1509_v42, 546218.0 }
 0x1ff   : > { %1764 = vst [vmem:[%s2844_s17 + $0x60] sm:$0xff] %v1636_v44  ;;  %v1512_v50 = vmax.f32 %v815_v48, 159620.0  ;;  %v1329_v51 = vpop.f32.mrb[8].mxu1  ;;  %v817_v52 = vpop.f32.mrb[9].mxu0 }
 0x200   : > { %v1639_v49 = vmin.f32 %v1511_v45, 546218.0  ;;  %1766 = vst [vmem:[%s2844_s17 + $0x70] sm:$0xff] %v1638_v46  ;;  %1765 = vst [vmem:[%s2844_s17 + $0x68] sm:$0xff] %v1637_v47  ;;  %v1514_v53 = vmax.f32 %v1329_v51, 159620.0 }
 0x201   : > { %v1513_v54 = vmax.f32 %v817_v52, 159620.0  ;;  %v1331_v55 = vpop.f32.mrb[9].mxu1  ;;  %v1640_v56 = vmin.f32 %v1512_v50, 546218.0  ;;  %v821_v60 = vpop.f32.mrb[10].mxu0 }
 0x202   : > { %1767 = vst [vmem:[%s2844_s17 + $0x78] sm:$0xff] %v1639_v49  ;;  %v1515_v57 = vmax.f32 %v1331_v55, 159620.0  ;;  %v1642_v58 = vmin.f32 %v1514_v53, 546218.0  ;;  %v1335_v63 = vpop.f32.mrb[10].mxu1 }
 0x203   : > { %v1641_v59 = vmin.f32 %v1513_v54, 546218.0  ;;  %1768 = vst [vmem:[%s2844_s17 + $0x80] sm:$0xff] %v1640_v56  ;;  %v1516_v62 = vmax.f32 %v821_v60, 159620.0  ;;  %v823_v0 = vpop.f32.mrb[11].mxu0 }
 0x204   : > { %v1643_v61 = vmin.f32 %v1515_v57, 546218.0  ;;  %1770 = vst [vmem:[%s2844_s17 + $0x90] sm:$0xff] %v1642_v58  ;;  %v1518_v1 = vmax.f32 %v1335_v63, 159620.0  ;;  %v1337_v3 = vpop.f32.mrb[11].mxu1 }
 0x205   : > { %1769 = vst [vmem:[%s2844_s17 + $0x88] sm:$0xff] %v1641_v59  ;;  %v1517_v2 = vmax.f32 %v823_v0, 159620.0  ;;  %v1644_v4 = vmin.f32 %v1516_v62, 546218.0  ;;  %v827_v8 = vpop.f32.mrb[12].mxu0 }
 0x206   : > { %1771 = vst [vmem:[%s2844_s17 + $0x98] sm:$0xff] %v1643_v61  ;;  %v1519_v5 = vmax.f32 %v1337_v3, 159620.0  ;;  %v1646_v6 = vmin.f32 %v1518_v1, 546218.0  ;;  %v1341_v11 = vpop.f32.mrb[12].mxu1 }
 0x207   : > { %v1645_v7 = vmin.f32 %v1517_v2, 546218.0  ;;  %1772 = vst [vmem:[%s2844_s17 + $0xa0] sm:$0xff] %v1644_v4  ;;  %v1520_v10 = vmax.f32 %v827_v8, 159620.0  ;;  %v829_v12 = vpop.f32.mrb[13].mxu0 }
 0x208   : > { %v1647_v9 = vmin.f32 %v1519_v5, 546218.0  ;;  %1774 = vst [vmem:[%s2844_s17 + $0xb0] sm:$0xff] %v1646_v6  ;;  %v1522_v13 = vmax.f32 %v1341_v11, 159620.0  ;;  %v1343_v15 = vpop.f32.mrb[13].mxu1 }
 0x209   : > { %1773 = vst [vmem:[%s2844_s17 + $0xa8] sm:$0xff] %v1645_v7  ;;  %v1521_v14 = vmax.f32 %v829_v12, 159620.0  ;;  %v1648_v16 = vmin.f32 %v1520_v10, 546218.0  ;;  %v833_v20 = vpop.f32.mrb[14].mxu0 }
 0x20a   : > { %1775 = vst [vmem:[%s2844_s17 + $0xb8] sm:$0xff] %v1647_v9  ;;  %v1523_v17 = vmax.f32 %v1343_v15, 159620.0  ;;  %v1650_v18 = vmin.f32 %v1522_v13, 546218.0  ;;  %v1347_v23 = vpop.f32.mrb[14].mxu1 }
 0x20b   : > { %v1649_v19 = vmin.f32 %v1521_v14, 546218.0  ;;  %1776 = vst [vmem:[%s2844_s17 + $0xc0] sm:$0xff] %v1648_v16  ;;  %v1524_v22 = vmax.f32 %v833_v20, 159620.0  ;;  %v835_v24 = vpop.f32.mrb[15].mxu0 }
 0x20c   : > { %v1651_v21 = vmin.f32 %v1523_v17, 546218.0  ;;  %1778 = vst [vmem:[%s2844_s17 + $0xd0] sm:$0xff] %v1650_v18  ;;  %v1526_v25 = vmax.f32 %v1347_v23, 159620.0  ;;  %v1349_v27 = vpop.f32.mrb[15].mxu1 }
 0x20d   : > { %1777 = vst [vmem:[%s2844_s17 + $0xc8] sm:$0xff] %v1649_v19  ;;  %v1525_v26 = vmax.f32 %v835_v24, 159620.0  ;;  %v1652_v28 = vmin.f32 %v1524_v22, 546218.0  ;;  %v839_v32 = vpop.f32.mrb[16].mxu0 }
 0x20e   : > { %1779 = vst [vmem:[%s2844_s17 + $0xd8] sm:$0xff] %v1651_v21  ;;  %v1527_v29 = vmax.f32 %v1349_v27, 159620.0  ;;  %v1654_v30 = vmin.f32 %v1526_v25, 546218.0  ;;  %v1353_v35 = vpop.f32.mrb[16].mxu1 }
 0x20f   : > { %v1653_v31 = vmin.f32 %v1525_v26, 546218.0  ;;  %1780 = vst [vmem:[%s2844_s17 + $0xe0] sm:$0xff] %v1652_v28  ;;  %v1528_v34 = vmax.f32 %v839_v32, 159620.0  ;;  %v841_v36 = vpop.f32.mrb[17].mxu0 }
 0x210   : > { %v1655_v33 = vmin.f32 %v1527_v29, 546218.0  ;;  %1782 = vst [vmem:[%s2844_s17 + $0xf0] sm:$0xff] %v1654_v30  ;;  %v1530_v37 = vmax.f32 %v1353_v35, 159620.0  ;;  %v1355_v39 = vpop.f32.mrb[17].mxu1 }
 0x211   : > { %1781 = vst [vmem:[%s2844_s17 + $0xe8] sm:$0xff] %v1653_v31  ;;  %v1529_v38 = vmax.f32 %v841_v36, 159620.0  ;;  %v1656_v40 = vmin.f32 %v1528_v34, 546218.0  ;;  %v845_v44 = vpop.f32.mrb[18].mxu0 }
 0x212   : > { %1783 = vst [vmem:[%s2844_s17 + $0xf8] sm:$0xff] %v1655_v33  ;;  %v1531_v41 = vmax.f32 %v1355_v39, 159620.0  ;;  %v1658_v42 = vmin.f32 %v1530_v37, 546218.0  ;;  %v1359_v47 = vpop.f32.mrb[18].mxu1 }
 0x213   : > { %v1657_v43 = vmin.f32 %v1529_v38, 546218.0  ;;  %1784 = vst [vmem:[%s2844_s17 + $0x100] sm:$0xff] %v1656_v40  ;;  %v1532_v46 = vmax.f32 %v845_v44, 159620.0  ;;  %v847_v48 = vpop.f32.mrb[19].mxu0 }
 0x214   : > { %v1659_v45 = vmin.f32 %v1531_v41, 546218.0  ;;  %1786 = vst [vmem:[%s2844_s17 + $0x110] sm:$0xff] %v1658_v42  ;;  %v1534_v49 = vmax.f32 %v1359_v47, 159620.0  ;;  %v1361_v51 = vpop.f32.mrb[19].mxu1 }
 0x215   : > { %1785 = vst [vmem:[%s2844_s17 + $0x108] sm:$0xff] %v1657_v43  ;;  %v1533_v50 = vmax.f32 %v847_v48, 159620.0  ;;  %v1660_v52 = vmin.f32 %v1532_v46, 546218.0  ;;  %v851_v56 = vpop.f32.mrb[20].mxu0 }
 0x216   : > { %1787 = vst [vmem:[%s2844_s17 + $0x118] sm:$0xff] %v1659_v45  ;;  %v1535_v53 = vmax.f32 %v1361_v51, 159620.0  ;;  %v1662_v54 = vmin.f32 %v1534_v49, 546218.0  ;;  %v1365_v59 = vpop.f32.mrb[20].mxu1 }
 0x217   : > { %v1661_v55 = vmin.f32 %v1533_v50, 546218.0  ;;  %1788 = vst [vmem:[%s2844_s17 + $0x120] sm:$0xff] %v1660_v52  ;;  %v1536_v58 = vmax.f32 %v851_v56, 159620.0  ;;  %v853_v60 = vpop.f32.mrb[21].mxu0 }
 0x218   : > { %v1663_v57 = vmin.f32 %v1535_v53, 546218.0  ;;  %1790 = vst [vmem:[%s2844_s17 + $0x130] sm:$0xff] %v1662_v54  ;;  %v1538_v61 = vmax.f32 %v1365_v59, 159620.0  ;;  %v1367_v63 = vpop.f32.mrb[21].mxu1 }
 0x219   : > { %1789 = vst [vmem:[%s2844_s17 + $0x128] sm:$0xff] %v1661_v55  ;;  %v1537_v62 = vmax.f32 %v853_v60, 159620.0  ;;  %v1664_v0 = vmin.f32 %v1536_v58, 546218.0  ;;  %v857_v4 = vpop.f32.mrb[22].mxu0 }
 0x21a   : > { %1791 = vst [vmem:[%s2844_s17 + $0x138] sm:$0xff] %v1663_v57  ;;  %v1539_v1 = vmax.f32 %v1367_v63, 159620.0  ;;  %v1666_v2 = vmin.f32 %v1538_v61, 546218.0  ;;  %v1371_v7 = vpop.f32.mrb[22].mxu1 }
 0x21b   : > { %v1665_v3 = vmin.f32 %v1537_v62, 546218.0  ;;  %1792 = vst [vmem:[%s2844_s17 + $0x140] sm:$0xff] %v1664_v0  ;;  %v1540_v6 = vmax.f32 %v857_v4, 159620.0  ;;  %v859_v8 = vpop.f32.mrb[23].mxu0 }
 0x21c   : > { %v1667_v5 = vmin.f32 %v1539_v1, 546218.0  ;;  %1794 = vst [vmem:[%s2844_s17 + $0x150] sm:$0xff] %v1666_v2  ;;  %v1542_v9 = vmax.f32 %v1371_v7, 159620.0  ;;  %v1373_v11 = vpop.f32.mrb[23].mxu1 }
 0x21d   : > { %1793 = vst [vmem:[%s2844_s17 + $0x148] sm:$0xff] %v1665_v3  ;;  %v1541_v10 = vmax.f32 %v859_v8, 159620.0  ;;  %v1668_v12 = vmin.f32 %v1540_v6, 546218.0  ;;  %v863_v16 = vpop.f32.mrb[24].mxu0 }
 0x21e   : > { %1795 = vst [vmem:[%s2844_s17 + $0x158] sm:$0xff] %v1667_v5  ;;  %v1543_v13 = vmax.f32 %v1373_v11, 159620.0  ;;  %v1670_v14 = vmin.f32 %v1542_v9, 546218.0  ;;  %v1377_v19 = vpop.f32.mrb[24].mxu1 }
 0x21f   : > { %v1669_v15 = vmin.f32 %v1541_v10, 546218.0  ;;  %1796 = vst [vmem:[%s2844_s17 + $0x160] sm:$0xff] %v1668_v12  ;;  %v1544_v18 = vmax.f32 %v863_v16, 159620.0  ;;  %v865_v20 = vpop.f32.mrb[25].mxu0 }
 0x220   : > { %v1671_v17 = vmin.f32 %v1543_v13, 546218.0  ;;  %1798 = vst [vmem:[%s2844_s17 + $0x170] sm:$0xff] %v1670_v14  ;;  %v1546_v21 = vmax.f32 %v1377_v19, 159620.0  ;;  %v1379_v23 = vpop.f32.mrb[25].mxu1 }
 0x221   : > { %1797 = vst [vmem:[%s2844_s17 + $0x168] sm:$0xff] %v1669_v15  ;;  %v1545_v22 = vmax.f32 %v865_v20, 159620.0  ;;  %v1672_v24 = vmin.f32 %v1544_v18, 546218.0  ;;  %v869_v28 = vpop.f32.mrb[26].mxu0 }
 0x222   : > { %1799 = vst [vmem:[%s2844_s17 + $0x178] sm:$0xff] %v1671_v17  ;;  %v1547_v25 = vmax.f32 %v1379_v23, 159620.0  ;;  %v1674_v26 = vmin.f32 %v1546_v21, 546218.0  ;;  %v1383_v31 = vpop.f32.mrb[26].mxu1 }
 0x223   : > { %v1673_v27 = vmin.f32 %v1545_v22, 546218.0  ;;  %1800 = vst [vmem:[%s2844_s17 + $0x180] sm:$0xff] %v1672_v24  ;;  %v1548_v30 = vmax.f32 %v869_v28, 159620.0  ;;  %v871_v32 = vpop.f32.mrb[27].mxu0 }
 0x224   : > { %v1675_v29 = vmin.f32 %v1547_v25, 546218.0  ;;  %1802 = vst [vmem:[%s2844_s17 + $0x190] sm:$0xff] %v1674_v26  ;;  %v1550_v33 = vmax.f32 %v1383_v31, 159620.0  ;;  %v1385_v35 = vpop.f32.mrb[27].mxu1 }
 0x225   : > { %1801 = vst [vmem:[%s2844_s17 + $0x188] sm:$0xff] %v1673_v27  ;;  %v1549_v34 = vmax.f32 %v871_v32, 159620.0  ;;  %v1676_v36 = vmin.f32 %v1548_v30, 546218.0  ;;  %v875_v40 = vpop.f32.mrb[28].mxu0 }
 0x226   : > { %1803 = vst [vmem:[%s2844_s17 + $0x198] sm:$0xff] %v1675_v29  ;;  %v1551_v37 = vmax.f32 %v1385_v35, 159620.0  ;;  %v1678_v38 = vmin.f32 %v1550_v33, 546218.0  ;;  %v1389_v43 = vpop.f32.mrb[28].mxu1 }
 0x227   : > { %v1677_v39 = vmin.f32 %v1549_v34, 546218.0  ;;  %1804 = vst [vmem:[%s2844_s17 + $0x1a0] sm:$0xff] %v1676_v36  ;;  %v1552_v42 = vmax.f32 %v875_v40, 159620.0  ;;  %v877_v44 = vpop.f32.mrb[29].mxu0 }
 0x228   : > { %v1679_v41 = vmin.f32 %v1551_v37, 546218.0  ;;  %1806 = vst [vmem:[%s2844_s17 + $0x1b0] sm:$0xff] %v1678_v38  ;;  %v1554_v45 = vmax.f32 %v1389_v43, 159620.0  ;;  %v1391_v47 = vpop.f32.mrb[29].mxu1 }
 0x229   : > { %1805 = vst [vmem:[%s2844_s17 + $0x1a8] sm:$0xff] %v1677_v39  ;;  %v1553_v46 = vmax.f32 %v877_v44, 159620.0  ;;  %v1680_v48 = vmin.f32 %v1552_v42, 546218.0  ;;  %v881_v52 = vpop.f32.mrb[30].mxu0 }
 0x22a   : > { %1807 = vst [vmem:[%s2844_s17 + $0x1b8] sm:$0xff] %v1679_v41  ;;  %v1555_v49 = vmax.f32 %v1391_v47, 159620.0  ;;  %v1682_v50 = vmin.f32 %v1554_v45, 546218.0  ;;  %v1395_v55 = vpop.f32.mrb[30].mxu1 }
 0x22b   : > { %v1681_v51 = vmin.f32 %v1553_v46, 546218.0  ;;  %1808 = vst [vmem:[%s2844_s17 + $0x1c0] sm:$0xff] %v1680_v48  ;;  %v1556_v54 = vmax.f32 %v881_v52, 159620.0  ;;  %v883_v56 = vpop.f32.mrb[31].mxu0 }
 0x22c   : > { %v1683_v53 = vmin.f32 %v1555_v49, 546218.0  ;;  %1810 = vst [vmem:[%s2844_s17 + $0x1d0] sm:$0xff] %v1682_v50  ;;  %v1558_v57 = vmax.f32 %v1395_v55, 159620.0  ;;  %v1397_v59 = vpop.f32.mrb[31].mxu1 }
 0x22d   : > { %1809 = vst [vmem:[%s2844_s17 + $0x1c8] sm:$0xff] %v1681_v51  ;;  %v1557_v58 = vmax.f32 %v883_v56, 159620.0  ;;  %v1684_v60 = vmin.f32 %v1556_v54, 546218.0  ;;  %v887_v0 = vpop.f32.mrb[32].mxu0 }
 0x22e   : > { %1811 = vst [vmem:[%s2844_s17 + $0x1d8] sm:$0xff] %v1683_v53  ;;  %v1559_v61 = vmax.f32 %v1397_v59, 159620.0  ;;  %v1686_v62 = vmin.f32 %v1558_v57, 546218.0  ;;  %v1401_v3 = vpop.f32.mrb[32].mxu1 }
 0x22f   : > { %v1685_v63 = vmin.f32 %v1557_v58, 546218.0  ;;  %1812 = vst [vmem:[%s2844_s17 + $0x1e0] sm:$0xff] %v1684_v60  ;;  %v1560_v2 = vmax.f32 %v887_v0, 159620.0  ;;  %v889_v4 = vpop.f32.mrb[33].mxu0 }
 0x230   : > { %v1687_v1 = vmin.f32 %v1559_v61, 546218.0  ;;  %1814 = vst [vmem:[%s2844_s17 + $0x1f0] sm:$0xff] %v1686_v62  ;;  %v1562_v5 = vmax.f32 %v1401_v3, 159620.0  ;;  %v1403_v7 = vpop.f32.mrb[33].mxu1 }
 0x231   : > { %1813 = vst [vmem:[%s2844_s17 + $0x1e8] sm:$0xff] %v1685_v63  ;;  %v1561_v6 = vmax.f32 %v889_v4, 159620.0  ;;  %v1688_v8 = vmin.f32 %v1560_v2, 546218.0  ;;  %v893_v12 = vpop.f32.mrb[34].mxu0 }
 0x232   : > { %1815 = vst [vmem:[%s2844_s17 + $0x1f8] sm:$0xff] %v1687_v1  ;;  %v1563_v9 = vmax.f32 %v1403_v7, 159620.0  ;;  %v1690_v10 = vmin.f32 %v1562_v5, 546218.0  ;;  %v1407_v15 = vpop.f32.mrb[34].mxu1 }
 0x233   : > { %v1689_v11 = vmin.f32 %v1561_v6, 546218.0  ;;  %1816 = vst [vmem:[%s2844_s17 + $0x200] sm:$0xff] %v1688_v8  ;;  %v1564_v14 = vmax.f32 %v893_v12, 159620.0  ;;  %v895_v16 = vpop.f32.mrb[35].mxu0 }
 0x234   : > { %v1691_v13 = vmin.f32 %v1563_v9, 546218.0  ;;  %1818 = vst [vmem:[%s2844_s17 + $0x210] sm:$0xff] %v1690_v10  ;;  %v1566_v17 = vmax.f32 %v1407_v15, 159620.0  ;;  %v1409_v19 = vpop.f32.mrb[35].mxu1 }
 0x235   : > { %1817 = vst [vmem:[%s2844_s17 + $0x208] sm:$0xff] %v1689_v11  ;;  %v1565_v18 = vmax.f32 %v895_v16, 159620.0  ;;  %v1692_v20 = vmin.f32 %v1564_v14, 546218.0  ;;  %v899_v24 = vpop.f32.mrb[36].mxu0 }
 0x236   : > { %1819 = vst [vmem:[%s2844_s17 + $0x218] sm:$0xff] %v1691_v13  ;;  %v1567_v21 = vmax.f32 %v1409_v19, 159620.0  ;;  %v1694_v22 = vmin.f32 %v1566_v17, 546218.0  ;;  %v1413_v27 = vpop.f32.mrb[36].mxu1 }
 0x237   : > { %v1693_v23 = vmin.f32 %v1565_v18, 546218.0  ;;  %1820 = vst [vmem:[%s2844_s17 + $0x220] sm:$0xff] %v1692_v20  ;;  %v1568_v26 = vmax.f32 %v899_v24, 159620.0  ;;  %v901_v28 = vpop.f32.mrb[37].mxu0 }
 0x238   : > { %v1695_v25 = vmin.f32 %v1567_v21, 546218.0  ;;  %1822 = vst [vmem:[%s2844_s17 + $0x230] sm:$0xff] %v1694_v22  ;;  %v1570_v29 = vmax.f32 %v1413_v27, 159620.0  ;;  %v1415_v31 = vpop.f32.mrb[37].mxu1 }
 0x239   : > { %1821 = vst [vmem:[%s2844_s17 + $0x228] sm:$0xff] %v1693_v23  ;;  %v1569_v30 = vmax.f32 %v901_v28, 159620.0  ;;  %v1696_v32 = vmin.f32 %v1568_v26, 546218.0  ;;  %v905_v36 = vpop.f32.mrb[38].mxu0 }
 0x23a   : > { %1823 = vst [vmem:[%s2844_s17 + $0x238] sm:$0xff] %v1695_v25  ;;  %v1571_v33 = vmax.f32 %v1415_v31, 159620.0  ;;  %v1698_v34 = vmin.f32 %v1570_v29, 546218.0  ;;  %v1419_v39 = vpop.f32.mrb[38].mxu1 }
 0x23b   : > { %v1697_v35 = vmin.f32 %v1569_v30, 546218.0  ;;  %1824 = vst [vmem:[%s2844_s17 + $0x240] sm:$0xff] %v1696_v32  ;;  %v1572_v38 = vmax.f32 %v905_v36, 159620.0  ;;  %v907_v40 = vpop.f32.mrb[39].mxu0 }
 0x23c   : > { %v1699_v37 = vmin.f32 %v1571_v33, 546218.0  ;;  %1826 = vst [vmem:[%s2844_s17 + $0x250] sm:$0xff] %v1698_v34  ;;  %v1574_v41 = vmax.f32 %v1419_v39, 159620.0  ;;  %v1421_v43 = vpop.f32.mrb[39].mxu1 }
 0x23d   : > { %1825 = vst [vmem:[%s2844_s17 + $0x248] sm:$0xff] %v1697_v35  ;;  %v1573_v42 = vmax.f32 %v907_v40, 159620.0  ;;  %v1700_v44 = vmin.f32 %v1572_v38, 546218.0  ;;  %v911_v48 = vpop.f32.mrb[40].mxu0 }
 0x23e   : > { %1827 = vst [vmem:[%s2844_s17 + $0x258] sm:$0xff] %v1699_v37  ;;  %v1575_v45 = vmax.f32 %v1421_v43, 159620.0  ;;  %v1702_v46 = vmin.f32 %v1574_v41, 546218.0  ;;  %v1425_v51 = vpop.f32.mrb[40].mxu1 }
 0x23f   : > { %v1701_v47 = vmin.f32 %v1573_v42, 546218.0  ;;  %1828 = vst [vmem:[%s2844_s17 + $0x260] sm:$0xff] %v1700_v44  ;;  %v1576_v50 = vmax.f32 %v911_v48, 159620.0  ;;  %v913_v52 = vpop.f32.mrb[41].mxu0 }
 0x240   : > { %v1703_v49 = vmin.f32 %v1575_v45, 546218.0  ;;  %1830 = vst [vmem:[%s2844_s17 + $0x270] sm:$0xff] %v1702_v46  ;;  %v1578_v53 = vmax.f32 %v1425_v51, 159620.0  ;;  %v1427_v55 = vpop.f32.mrb[41].mxu1 }
 0x241   : > { %1829 = vst [vmem:[%s2844_s17 + $0x268] sm:$0xff] %v1701_v47  ;;  %v1577_v54 = vmax.f32 %v913_v52, 159620.0  ;;  %v1704_v56 = vmin.f32 %v1576_v50, 546218.0  ;;  %v917_v60 = vpop.f32.mrb[42].mxu0 }
 0x242   : > { %1831 = vst [vmem:[%s2844_s17 + $0x278] sm:$0xff] %v1703_v49  ;;  %v1579_v57 = vmax.f32 %v1427_v55, 159620.0  ;;  %v1706_v58 = vmin.f32 %v1578_v53, 546218.0  ;;  %v1431_v63 = vpop.f32.mrb[42].mxu1 }
 0x243   : > { %v1705_v59 = vmin.f32 %v1577_v54, 546218.0  ;;  %1832 = vst [vmem:[%s2844_s17 + $0x280] sm:$0xff] %v1704_v56  ;;  %v1580_v62 = vmax.f32 %v917_v60, 159620.0  ;;  %v919_v0 = vpop.f32.mrb[43].mxu0 }
 0x244   : > { %v1707_v61 = vmin.f32 %v1579_v57, 546218.0  ;;  %1834 = vst [vmem:[%s2844_s17 + $0x290] sm:$0xff] %v1706_v58  ;;  %v1582_v1 = vmax.f32 %v1431_v63, 159620.0  ;;  %v1433_v3 = vpop.f32.mrb[43].mxu1 }
 0x245   : > { %1833 = vst [vmem:[%s2844_s17 + $0x288] sm:$0xff] %v1705_v59  ;;  %v1581_v2 = vmax.f32 %v919_v0, 159620.0  ;;  %v1708_v4 = vmin.f32 %v1580_v62, 546218.0  ;;  %v923_v8 = vpop.f32.mrb[44].mxu0 }
 0x246   : > { %1835 = vst [vmem:[%s2844_s17 + $0x298] sm:$0xff] %v1707_v61  ;;  %v1583_v5 = vmax.f32 %v1433_v3, 159620.0  ;;  %v1710_v6 = vmin.f32 %v1582_v1, 546218.0  ;;  %v1437_v11 = vpop.f32.mrb[44].mxu1 }
 0x247   : > { %v1709_v7 = vmin.f32 %v1581_v2, 546218.0  ;;  %1836 = vst [vmem:[%s2844_s17 + $0x2a0] sm:$0xff] %v1708_v4  ;;  %v1584_v10 = vmax.f32 %v923_v8, 159620.0  ;;  %v925_v12 = vpop.f32.mrb[45].mxu0 }
 0x248   : > { %v1711_v9 = vmin.f32 %v1583_v5, 546218.0  ;;  %1838 = vst [vmem:[%s2844_s17 + $0x2b0] sm:$0xff] %v1710_v6  ;;  %v1586_v13 = vmax.f32 %v1437_v11, 159620.0  ;;  %v1439_v15 = vpop.f32.mrb[45].mxu1 }
 0x249   : > { %1837 = vst [vmem:[%s2844_s17 + $0x2a8] sm:$0xff] %v1709_v7  ;;  %v1585_v14 = vmax.f32 %v925_v12, 159620.0  ;;  %v1712_v16 = vmin.f32 %v1584_v10, 546218.0  ;;  %v929_v20 = vpop.f32.mrb[46].mxu0 }
 0x24a   : > { %1839 = vst [vmem:[%s2844_s17 + $0x2b8] sm:$0xff] %v1711_v9  ;;  %v1587_v17 = vmax.f32 %v1439_v15, 159620.0  ;;  %v1714_v18 = vmin.f32 %v1586_v13, 546218.0  ;;  %v1443_v23 = vpop.f32.mrb[46].mxu1 }
 0x24b   : > { %v1713_v19 = vmin.f32 %v1585_v14, 546218.0  ;;  %1840 = vst [vmem:[%s2844_s17 + $0x2c0] sm:$0xff] %v1712_v16  ;;  %v1588_v22 = vmax.f32 %v929_v20, 159620.0  ;;  %v931_v24 = vpop.f32.mrb[47].mxu0 }
 0x24c   : > { %v1715_v21 = vmin.f32 %v1587_v17, 546218.0  ;;  %1842 = vst [vmem:[%s2844_s17 + $0x2d0] sm:$0xff] %v1714_v18  ;;  %v1590_v25 = vmax.f32 %v1443_v23, 159620.0  ;;  %v1445_v27 = vpop.f32.mrb[47].mxu1 }
 0x24d   : > { %1841 = vst [vmem:[%s2844_s17 + $0x2c8] sm:$0xff] %v1713_v19  ;;  %v1589_v26 = vmax.f32 %v931_v24, 159620.0  ;;  %v1716_v28 = vmin.f32 %v1588_v22, 546218.0  ;;  %v935_v32 = vpop.f32.mrb[48].mxu0 }
 0x24e   : > { %1843 = vst [vmem:[%s2844_s17 + $0x2d8] sm:$0xff] %v1715_v21  ;;  %v1591_v29 = vmax.f32 %v1445_v27, 159620.0  ;;  %v1718_v30 = vmin.f32 %v1590_v25, 546218.0  ;;  %v1449_v35 = vpop.f32.mrb[48].mxu1 }
 0x24f   : > { %v1717_v31 = vmin.f32 %v1589_v26, 546218.0  ;;  %1844 = vst [vmem:[%s2844_s17 + $0x2e0] sm:$0xff] %v1716_v28  ;;  %v1592_v34 = vmax.f32 %v935_v32, 159620.0  ;;  %v937_v36 = vpop.f32.mrb[49].mxu0 }
 0x250   : > { %v1719_v33 = vmin.f32 %v1591_v29, 546218.0  ;;  %1846 = vst [vmem:[%s2844_s17 + $0x2f0] sm:$0xff] %v1718_v30  ;;  %v1594_v37 = vmax.f32 %v1449_v35, 159620.0  ;;  %v1451_v39 = vpop.f32.mrb[49].mxu1 }
 0x251   : > { %1845 = vst [vmem:[%s2844_s17 + $0x2e8] sm:$0xff] %v1717_v31  ;;  %v1593_v38 = vmax.f32 %v937_v36, 159620.0  ;;  %v1720_v40 = vmin.f32 %v1592_v34, 546218.0  ;;  %v941_v44 = vpop.f32.mrb[50].mxu0 }
 0x252   : > { %1847 = vst [vmem:[%s2844_s17 + $0x2f8] sm:$0xff] %v1719_v33  ;;  %v1595_v41 = vmax.f32 %v1451_v39, 159620.0  ;;  %v1722_v42 = vmin.f32 %v1594_v37, 546218.0  ;;  %v1455_v47 = vpop.f32.mrb[50].mxu1 }
 0x253   : > { %v1721_v43 = vmin.f32 %v1593_v38, 546218.0  ;;  %1848 = vst [vmem:[%s2844_s17 + $0x300] sm:$0xff] %v1720_v40  ;;  %v1596_v46 = vmax.f32 %v941_v44, 159620.0  ;;  %v943_v48 = vpop.f32.mrb[51].mxu0 }
 0x254   : > { %v1723_v45 = vmin.f32 %v1595_v41, 546218.0  ;;  %1850 = vst [vmem:[%s2844_s17 + $0x310] sm:$0xff] %v1722_v42  ;;  %v1598_v49 = vmax.f32 %v1455_v47, 159620.0  ;;  %v1457_v51 = vpop.f32.mrb[51].mxu1 }
 0x255   : > { %1849 = vst [vmem:[%s2844_s17 + $0x308] sm:$0xff] %v1721_v43  ;;  %v1597_v50 = vmax.f32 %v943_v48, 159620.0  ;;  %v1724_v52 = vmin.f32 %v1596_v46, 546218.0  ;;  %v947_v56 = vpop.f32.mrb[52].mxu0 }
 0x256   : > { %1851 = vst [vmem:[%s2844_s17 + $0x318] sm:$0xff] %v1723_v45  ;;  %v1599_v53 = vmax.f32 %v1457_v51, 159620.0  ;;  %v1726_v54 = vmin.f32 %v1598_v49, 546218.0  ;;  %v1461_v59 = vpop.f32.mrb[52].mxu1 }
 0x257   : > { %v1725_v55 = vmin.f32 %v1597_v50, 546218.0  ;;  %1852 = vst [vmem:[%s2844_s17 + $0x320] sm:$0xff] %v1724_v52  ;;  %v1600_v58 = vmax.f32 %v947_v56, 159620.0  ;;  %v949_v60 = vpop.f32.mrb[53].mxu0 }
 0x258   : > { %v1727_v57 = vmin.f32 %v1599_v53, 546218.0  ;;  %1854 = vst [vmem:[%s2844_s17 + $0x330] sm:$0xff] %v1726_v54  ;;  %v1602_v61 = vmax.f32 %v1461_v59, 159620.0  ;;  %v1463_v63 = vpop.f32.mrb[53].mxu1 }
 0x259   : > { %1853 = vst [vmem:[%s2844_s17 + $0x328] sm:$0xff] %v1725_v55  ;;  %v1601_v62 = vmax.f32 %v949_v60, 159620.0  ;;  %v1728_v0 = vmin.f32 %v1600_v58, 546218.0  ;;  %v953_v4 = vpop.f32.mrb[54].mxu0 }
 0x25a   : > { %1855 = vst [vmem:[%s2844_s17 + $0x338] sm:$0xff] %v1727_v57  ;;  %v1603_v1 = vmax.f32 %v1463_v63, 159620.0  ;;  %v1730_v2 = vmin.f32 %v1602_v61, 546218.0  ;;  %v1467_v7 = vpop.f32.mrb[54].mxu1 }
 0x25b   : > { %v1729_v3 = vmin.f32 %v1601_v62, 546218.0  ;;  %1856 = vst [vmem:[%s2844_s17 + $0x340] sm:$0xff] %v1728_v0  ;;  %v1604_v6 = vmax.f32 %v953_v4, 159620.0  ;;  %v955_v8 = vpop.f32.mrb[55].mxu0 }
 0x25c   : > { %v1731_v5 = vmin.f32 %v1603_v1, 546218.0  ;;  %1858 = vst [vmem:[%s2844_s17 + $0x350] sm:$0xff] %v1730_v2  ;;  %v1606_v9 = vmax.f32 %v1467_v7, 159620.0  ;;  %v1469_v11 = vpop.f32.mrb[55].mxu1 }
 0x25d   : > { %1857 = vst [vmem:[%s2844_s17 + $0x348] sm:$0xff] %v1729_v3  ;;  %v1605_v10 = vmax.f32 %v955_v8, 159620.0  ;;  %v1732_v12 = vmin.f32 %v1604_v6, 546218.0  ;;  %v959_v16 = vpop.f32.mrb[56].mxu0 }
 0x25e   : > { %1859 = vst [vmem:[%s2844_s17 + $0x358] sm:$0xff] %v1731_v5  ;;  %v1607_v13 = vmax.f32 %v1469_v11, 159620.0  ;;  %v1734_v14 = vmin.f32 %v1606_v9, 546218.0  ;;  %v1473_v19 = vpop.f32.mrb[56].mxu1 }
 0x25f   : > { %v1733_v15 = vmin.f32 %v1605_v10, 546218.0  ;;  %1860 = vst [vmem:[%s2844_s17 + $0x360] sm:$0xff] %v1732_v12  ;;  %v1608_v18 = vmax.f32 %v959_v16, 159620.0  ;;  %v961_v20 = vpop.f32.mrb[57].mxu0 }
 0x260   : > { %v1735_v17 = vmin.f32 %v1607_v13, 546218.0  ;;  %1862 = vst [vmem:[%s2844_s17 + $0x370] sm:$0xff] %v1734_v14  ;;  %v1610_v21 = vmax.f32 %v1473_v19, 159620.0  ;;  %v1475_v23 = vpop.f32.mrb[57].mxu1 }
 0x261   : > { %1861 = vst [vmem:[%s2844_s17 + $0x368] sm:$0xff] %v1733_v15  ;;  %v1609_v22 = vmax.f32 %v961_v20, 159620.0  ;;  %v1736_v24 = vmin.f32 %v1608_v18, 546218.0  ;;  %v965_v28 = vpop.f32.mrb[58].mxu0 }
 0x262   : > { %1863 = vst [vmem:[%s2844_s17 + $0x378] sm:$0xff] %v1735_v17  ;;  %v1611_v25 = vmax.f32 %v1475_v23, 159620.0  ;;  %v1738_v26 = vmin.f32 %v1610_v21, 546218.0  ;;  %v1479_v31 = vpop.f32.mrb[58].mxu1 }
 0x263   : > { %v1737_v27 = vmin.f32 %v1609_v22, 546218.0  ;;  %1864 = vst [vmem:[%s2844_s17 + $0x380] sm:$0xff] %v1736_v24  ;;  %v1612_v30 = vmax.f32 %v965_v28, 159620.0  ;;  %v967_v32 = vpop.f32.mrb[59].mxu0 }
 0x264   : > { %v1739_v29 = vmin.f32 %v1611_v25, 546218.0  ;;  %1866 = vst [vmem:[%s2844_s17 + $0x390] sm:$0xff] %v1738_v26  ;;  %v1614_v33 = vmax.f32 %v1479_v31, 159620.0  ;;  %v1481_v35 = vpop.f32.mrb[59].mxu1 }
 0x265   : > { %1865 = vst [vmem:[%s2844_s17 + $0x388] sm:$0xff] %v1737_v27  ;;  %v1613_v34 = vmax.f32 %v967_v32, 159620.0  ;;  %v1740_v36 = vmin.f32 %v1612_v30, 546218.0  ;;  %v971_v40 = vpop.f32.mrb[60].mxu0 }
 0x266   : > { %1867 = vst [vmem:[%s2844_s17 + $0x398] sm:$0xff] %v1739_v29  ;;  %v1615_v37 = vmax.f32 %v1481_v35, 159620.0  ;;  %v1742_v38 = vmin.f32 %v1614_v33, 546218.0  ;;  %v1485_v43 = vpop.f32.mrb[60].mxu1 }
 0x267   : > { %v1741_v39 = vmin.f32 %v1613_v34, 546218.0  ;;  %1868 = vst [vmem:[%s2844_s17 + $0x3a0] sm:$0xff] %v1740_v36  ;;  %v1616_v42 = vmax.f32 %v971_v40, 159620.0  ;;  %v973_v44 = vpop.f32.mrb[61].mxu0 }
 0x268   : > { %v1743_v41 = vmin.f32 %v1615_v37, 546218.0  ;;  %1870 = vst [vmem:[%s2844_s17 + $0x3b0] sm:$0xff] %v1742_v38  ;;  %v1618_v45 = vmax.f32 %v1485_v43, 159620.0  ;;  %v1487_v47 = vpop.f32.mrb[61].mxu1 }
 0x269   : > { %1869 = vst [vmem:[%s2844_s17 + $0x3a8] sm:$0xff] %v1741_v39  ;;  %v1617_v46 = vmax.f32 %v973_v44, 159620.0  ;;  %v1744_v48 = vmin.f32 %v1616_v42, 546218.0  ;;  %v977_v52 = vpop.f32.mrb[62].mxu0 }
 0x26a   : > { %1871 = vst [vmem:[%s2844_s17 + $0x3b8] sm:$0xff] %v1743_v41  ;;  %v1619_v49 = vmax.f32 %v1487_v47, 159620.0  ;;  %v1746_v50 = vmin.f32 %v1618_v45, 546218.0  ;;  %v1491_v55 = vpop.f32.mrb[62].mxu1 }
 0x26b   : > { %v1745_v51 = vmin.f32 %v1617_v46, 546218.0  ;;  %1872 = vst [vmem:[%s2844_s17 + $0x3c0] sm:$0xff] %v1744_v48  ;;  %v1620_v54 = vmax.f32 %v977_v52, 159620.0  ;;  %v979_v56 = vpop.f32.mrb[63].mxu0 }
 0x26c   : > { %v1747_v53 = vmin.f32 %v1619_v49, 546218.0  ;;  %1874 = vst [vmem:[%s2844_s17 + $0x3d0] sm:$0xff] %v1746_v50  ;;  %v1622_v57 = vmax.f32 %v1491_v55, 159620.0  ;;  %v1493_v59 = vpop.f32.mrb[63].mxu1 }
 0x26d   : > { %1873 = vst [vmem:[%s2844_s17 + $0x3c8] sm:$0xff] %v1745_v51  ;;  %v1621_v58 = vmax.f32 %v979_v56, 159620.0  ;;  %v1748_v60 = vmin.f32 %v1620_v54, 546218.0 }
 0x26e   : > { %1875 = vst [vmem:[%s2844_s17 + $0x3d8] sm:$0xff] %v1747_v53  ;;  %v1623_v61 = vmax.f32 %v1493_v59, 159620.0  ;;  %v1750_v62 = vmin.f32 %v1622_v57, 546218.0 }
 0x26f   : > { %v1749_v63 = vmin.f32 %v1621_v58, 546218.0  ;;  %1876 = vst [vmem:[%s2844_s17 + $0x3e0] sm:$0xff] %v1748_v60 }
 0x270   : > { %v1751_v0 = vmin.f32 %v1623_v61, 546218.0  ;;  %1878 = vst [vmem:[%s2844_s17 + $0x3f0] sm:$0xff] %v1750_v62 }
 0x271   : > { %1877 = vst [vmem:[%s2844_s17 + $0x3e8] sm:$0xff] %v1749_v63 }
 0x272   : > { %1879 = vst [vmem:[%s2844_s17 + $0x3f8] sm:$0xff] %v1751_v0 }
 0x273   : > { %2454 = shalt.err (!%p2451_p7)
}
 0x274   : > { %s2455_s24 = scalar_lea.hbm %s2975_s28, 16384  ;;  %s2459_s26 = scalar_lea.hbm %s3026_s2, 163840 }
 0x275   : > { %p2456_p9 = scmp.ne.s32.totalorder %s2975_s28, %s2455_s24  ;;  %p2460_p5 = scmp.lt.u32.totalorder %s2975_s28, %s3026_s2 }
 0x276   : > { %p2461_p10 = scmp.lt.u32.totalorder %s2459_s26, %s2455_s24  ;;  %p2463_p1 = scmp.lt.u32.totalorder %s2455_s24, %s2975_s28 }
 0x277   : > { %p2457_p11 = pnand %p2456_p9, %p2621_p12 }
 0x278   : > { %p2462_p2 = por %p2461_p10, %p2460_p5 }
 0x279   : > { %p2458_p0 = pneg %p2457_p11 }
 0x27a   : > { %p2464_p4 = por %p2463_p1, %p2462_p2 }
 0x27c   : > { %p2465_p6 = pnand %p2464_p4, %p2458_p0 }
 0x27e   : > { %2468 = shalt.err (!%p2465_p6)
}
 0x27f   : > { %s2521_s3 = smov 512   ;;  %s2522_s15 = smov 32  }
 0x280   : > { %2325 = dma.vmem_to_hbm [thread:$0]  (%p2621_p12), %s2977_s19, 16384, %s2975_s28, %s1881_s4, %s2521_s3, %s2521_s3, %s2522_s15  }
 0x281 PF: > { %p2342_p8 = scmp.ge.s32.totalorder %s2511_s12, 2  ;;  %s1910_s17 = sand.u32 1, %s2499_s9  }
 0x282   : > { %p3041_p13 = scmp.ne.s32.totalorder %s3031_s16, 0  ;;  %s1911_s27 = scalar_lea.sflag [#allocation4], %s1910_s17 }
 0x284   : > { %p2336_p3 = pnand %p2342_p8, %p3041_p13 }
 0x286   : > { %2494 = dma.done.wait (!%p2336_p3), %s1911_s27, 16384  }
 0x287   : > { %2496 = vsyncadd (!%p2336_p3), %s1911_s27, 4294950912  ;;  %p16_p7 = scmp.ge.s32.totalorder %s2591_s21, 12   ;;  %s3042_s9 = smov %s2503_s10 }
 0x288   : > { %s3043_s10 = smov %s2507_s11  ;;  %s3044_s11 = smov %s2617_s8 }
 0x289   : > { %s3045_s12 = smov %s2591_s21  ;;  %18 = sbr.rel (!%p16_p7) target bundleno = 6 (0x6), region = 77 }
 0x290   :  { %1916 = vsyncpa [#allocation3], 1 }
 0x291   :  { %1918 = vsyncpa [#allocation3 + $0x1], 1 }
 0x292   :  { %1919 = vsyncpa [#allocation6], 1 }
 0x293   :  { %1920 = vsyncpa [#allocation4], 1 }
 0x294   :  { %1922 = vsyncpa [#allocation4 + $0x1], 1 }

</bundles_post_ra>
